<compile_context>
chip_gen: v5e
topology: v5e:2x2
jax: 0.10.0
libtpu: 0.0.40
codegen_flags: <defaults>
</compile_context>

<pallas_src>
import functools
import math

import jax
import jax.numpy as jnp
from jax.experimental import pallas as pl
from jax.experimental.pallas import tpu as pltpu


PARAM_NAMES = (
    "wqkv_s", "bqkv_s", "wo_s", "bo_s", "ln1_g", "ln1_b",
    "wq_c", "bq_c", "wkv_c", "bkv_c", "wo_c", "bo_c", "ln2_g", "ln2_b",
    "ffn_ln_g", "ffn_ln_b", "w1", "b1", "w2", "b2",
)


# ------------------------------ in-kernel helpers ----------------------------

def _layer_norm(y, g, b):
    # nn.LayerNorm(eps=1e-6) convention: biased variance, eps added to the variance.
    mu = jnp.mean(y, axis=-1, keepdims=True)
    var = jnp.mean((y - mu) ** 2, axis=-1, keepdims=True)
    return (y - mu) * jax.lax.rsqrt(var + 1e-6) * g + b


def _softmax_rows(s):
    # masked positions already carry an additive -1e18 bias
    p = jnp.exp(s - jnp.max(s, axis=-1, keepdims=True))
    return p * pl.reciprocal(jnp.sum(p, axis=-1, keepdims=True), approx=True)


# ------------------------------ fused decoder kernel -------------------------

def _decoder_kernel(
    # activations / masks (per-batch blocks, layer-invariant)
    tgt_ref, mem_ref, self_bias_ref, src_bias_ref,
    # stacked per-layer weights (one layer streamed per grid step)
    wqkv_s_ref, bqkv_s_ref, wo_s_ref, bo_s_ref, ln1_g_ref, ln1_b_ref,
    wq_c_ref, bq_c_ref, wkv_c_ref, bkv_c_ref, wo_c_ref, bo_c_ref,
    ln2_g_ref, ln2_b_ref, ffn_ln_g_ref, ffn_ln_b_ref,
    w1_ref, b1_ref, w2_ref, b2_ref,
    # outputs
    reps_ref, attn_ref,
    # scratch
    x_carry,
    *, heads, d_k, d_v,
):
    l = pl.program_id(1)

    # First layer of this batch block: load the target embedding into the carried activation.
    @pl.when(l == 0)
    def _():
        x_carry[...] = tgt_ref[0]

    x = x_carry[...]                              # [Tq, D]
    mem = mem_ref[0]                              # [Tk, D]
    Tq = x.shape[0]
    scale = 1.0 / math.sqrt(d_k)
    hk = heads * d_k

    # ----------------- self attention (attention probs are NOT stored) -----------------
    qkv = jnp.dot(x, wqkv_s_ref[0], preferred_element_type=jnp.float32) + bqkv_s_ref[0]
    self_bias = self_bias_ref[0]                  # [Tq, Tq] additive (-1e18 / 0)
    wo_s = wo_s_ref[0]                            # [H*d_v, D]
    q_attn = bo_s_ref[0]                          # starts at the bias, accumulate per head
    for h in range(heads):
        qh = qkv[:, h * d_k:(h + 1) * d_k] * scale
        kh = qkv[:, hk + h * d_k: hk + (h + 1) * d_k]
        vh = qkv[:, 2 * hk + h * d_v: 2 * hk + (h + 1) * d_v]
        s = jnp.einsum("qd,kd->qk", qh, kh, preferred_element_type=jnp.float32) + self_bias
        a = _softmax_rows(s)
        ctx_h = jnp.dot(a, vh, preferred_element_type=jnp.float32)
        q_attn = q_attn + jnp.dot(ctx_h, wo_s[h * d_v:(h + 1) * d_v, :],
                                  preferred_element_type=jnp.float32)
    q_norm = _layer_norm(q_attn + x, ln1_g_ref[0], ln1_b_ref[0])

    # ----------------- context attention (probs are an output) -------------------------
    qc = jnp.dot(q_norm, wq_c_ref[0], preferred_element_type=jnp.float32) + bq_c_ref[0]
    kv = jnp.dot(mem, wkv_c_ref[0], preferred_element_type=jnp.float32) + bkv_c_ref[0]
    src_bias = src_bias_ref[0]                    # [1, Tk] additive, broadcast over queries
    wo_c = wo_c_ref[0]                            # [H*d_v, D]
    mid = bo_c_ref[0]
    for h in range(heads):
        qh = qc[:, h * d_k:(h + 1) * d_k] * scale
        kh = kv[:, h * d_k:(h + 1) * d_k]
        vh = kv[:, hk + h * d_v: hk + (h + 1) * d_v]
        s = jnp.einsum("qd,kd->qk", qh, kh, preferred_element_type=jnp.float32) + src_bias
        a = _softmax_rows(s)                      # [Tq, Tk]
        attn_ref[0, 0, h * Tq:(h + 1) * Tq, :] = a
        mid_h = jnp.dot(a, vh, preferred_element_type=jnp.float32)
        mid = mid + jnp.dot(mid_h, wo_c[h * d_v:(h + 1) * d_v, :],
                            preferred_element_type=jnp.float32)
    m_norm = _layer_norm(mid + q_norm, ln2_g_ref[0], ln2_b_ref[0])

    # ----------------- position-wise feed-forward --------------------------------------
    xn = _layer_norm(m_norm, ffn_ln_g_ref[0], ffn_ln_b_ref[0])
    hid = jnp.maximum(
        jnp.dot(xn, w1_ref[0], preferred_element_type=jnp.float32) + b1_ref[0], 0.0)
    out = jnp.dot(hid, w2_ref[0], preferred_element_type=jnp.float32) + b2_ref[0] + m_norm

    x_carry[...] = out
    reps_ref[0, 0, :, :] = out


# ------------------------------ JAX wrapper ----------------------------------

def decoder_forward(params, memory_bank, memory_len, tgt_pad_mask, tgt_emb,
                    heads, d_k, d_v):
    """Equivalent of Decoder.forward(memory_bank, memory_len, tgt_pad_mask, tgt_emb)."""
    B, Tq, D = tgt_emb.shape
    Tk = memory_bank.shape[1]
    L = params["wqkv_s"].shape[0]
    d_ff = params["w1"].shape[-1]

    # Additive biases, computed ONCE (layer- and head-invariant).
    neg = jnp.float32(-1e18)
    src_bias = jnp.where(jnp.arange(Tk)[None, :] >= memory_len[:, None], neg, 0.0)
    src_bias = src_bias.astype(jnp.float32)[:, None, :]                 # [B, 1, Tk]
    future = jnp.triu(jnp.ones((Tq, Tq), jnp.float32), k=1) > 0.0       # causal mask
    self_bias = jnp.where(tgt_pad_mask[:, None, :] | future[None], neg, 0.0)
    self_bias = self_bias.astype(jnp.float32)                           # [B, Tq, Tq]

    kernel = functools.partial(_decoder_kernel, heads=heads, d_k=d_k, d_v=d_v)

    in_specs = [
        pl.BlockSpec((1, Tq, D), lambda b, l: (b, 0, 0)),     # tgt_emb
        pl.BlockSpec((1, Tk, D), lambda b, l: (b, 0, 0)),     # memory_bank
        pl.BlockSpec((1, Tq, Tq), lambda b, l: (b, 0, 0)),    # self-attn additive bias
        pl.BlockSpec((1, 1, Tk), lambda b, l: (b, 0, 0)),     # src additive bias
    ] + [
        pl.BlockSpec((1,) + tuple(params[name].shape[1:]), lambda b, l: (l, 0, 0))
        for name in PARAM_NAMES                               # stream one layer per step
    ]

    out_shape = (
        jax.ShapeDtypeStruct((L, B, Tq, D), jnp.float32),            # per-layer outputs
        jax.ShapeDtypeStruct((L, B, heads * Tq, Tk), jnp.float32),   # per-layer ctx attention
    )
    out_specs = (
        pl.BlockSpec((1, 1, Tq, D), lambda b, l: (l, b, 0, 0)),
        pl.BlockSpec((1, 1, heads * Tq, Tk), lambda b, l: (l, b, 0, 0)),
    )

    flops_per_bl = (
        2 * Tq * D * (3 * heads * d_k) + 2 * Tq * (heads * d_v) * D
        + 4 * heads * Tq * Tq * d_k
        + 2 * Tq * D * (heads * d_k) + 2 * Tk * D * (heads * (d_k + d_v))
        + 2 * Tq * (heads * d_v) * D + 4 * heads * Tq * Tk * d_k
        + 2 * Tq * D * d_ff + 2 * Tq * d_ff * D)
    weight_bytes = sum(int(params[n].size) for n in PARAM_NAMES) * 4
    cost = pl.CostEstimate(
        flops=int(B * L * flops_per_bl),
        transcendentals=int(B * L * heads * Tq * (Tq + Tk)),
        bytes_accessed=int(B * weight_bytes
                           + 4 * B * (Tq * D + Tk * D + Tq * Tq + Tk)
                           + 4 * L * B * (Tq * D + heads * Tq * Tk)),
    )

    reps_stack, attn_stack = pl.pallas_call(
        kernel,
        grid_spec=pltpu.PrefetchScalarGridSpec(
            num_scalar_prefetch=0,
            grid=(B, L),                  # (parallel batch, sequential layer carry)
            in_specs=in_specs,
            out_specs=out_specs,
            scratch_shapes=[pltpu.VMEM((Tq, D), jnp.float32)],   # carried activation
        ),
        out_shape=out_shape,
        compiler_params=pltpu.CompilerParams(
            dimension_semantics=("parallel", "arbitrary"),
            vmem_limit_bytes=64 * 1024 * 1024),
        cost_estimate=cost,
    )(tgt_emb, memory_bank, self_bias, src_bias, *[params[n] for n in PARAM_NAMES])

    attn_stack = attn_stack.reshape(L, B, heads, Tq, Tk)
    representations = [reps_stack[i] for i in range(L)]
    std_attns = [attn_stack[i] for i in range(L)]
    # TODO(synk): coverage-attention and split-decoder (copy-attn) fusion paths not implemented.
    return representations, {"std": std_attns}


# ---------------------------- parameter init ----------------------------------

def init_params(key, nlayers, d_model, heads, d_k, d_v, d_ff):
    def dense(k, fan_in, fan_out):
        kw, kb = jax.random.split(k)
        s = 1.0 / math.sqrt(fan_in)
        w = jax.random.uniform(kw, (fan_in, fan_out), jnp.float32, -s, s)
        b = jax.random.uniform(kb, (1, fan_out), jnp.float32, -s, s)
        return w, b

    acc = {name: [] for name in PARAM_NAMES}
    ones = jnp.ones((1, d_model), jnp.float32)
    zeros = jnp.zeros((1, d_model), jnp.float32)
    for i in range(nlayers):
        lk = jax.random.fold_in(key, i)
        ks = jax.random.split(lk, 10)
        # self attention (fused QKV)
        wq, bq = dense(ks[0], d_model, heads * d_k)
        wk, bk = dense(ks[1], d_model, heads * d_k)
        wv, bv = dense(ks[2], d_model, heads * d_v)
        wo, bo = dense(ks[3], heads * d_v, d_model)
        acc["wqkv_s"].append(jnp.concatenate([wq, wk, wv], axis=1))
        acc["bqkv_s"].append(jnp.concatenate([bq, bk, bv], axis=1))
        acc["wo_s"].append(wo); acc["bo_s"].append(bo)
        acc["ln1_g"].append(ones); acc["ln1_b"].append(zeros)
        # context attention (fused KV over memory, separate Q over decoder state)
        wqc, bqc = dense(ks[4], d_model, heads * d_k)
        wkc, bkc = dense(ks[5], d_model, heads * d_k)
        wvc, bvc = dense(ks[6], d_model, heads * d_v)
        woc, boc = dense(ks[7], heads * d_v, d_model)
        acc["wq_c"].append(wqc); acc["bq_c"].append(bqc)
        acc["wkv_c"].append(jnp.concatenate([wkc, wvc], axis=1))
        acc["bkv_c"].append(jnp.concatenate([bkc, bvc], axis=1))
        acc["wo_c"].append(woc); acc["bo_c"].append(boc)
        acc["ln2_g"].append(ones); acc["ln2_b"].append(zeros)
        # position-wise feed-forward
        w1, b1 = dense(ks[8], d_model, d_ff)
        w2, b2 = dense(ks[9], d_ff, d_model)
        acc["ffn_ln_g"].append(ones); acc["ffn_ln_b"].append(zeros)
        acc["w1"].append(w1); acc["b1"].append(b1)
        acc["w2"].append(w2); acc["b2"].append(b2)
    return {name: jnp.stack(v, axis=0) for name, v in acc.items()}


# --------------------------------- main ----------------------------------------

if __name__ == "__main__":
    B, Tsrc, Ttgt = 2, 12, 8
    d_model, heads, d_k, d_v, d_ff, nlayers = 32, 2, 16, 16, 64, 2

    key = jax.random.PRNGKey(0)
    kp, km, kt = jax.random.split(key, 3)

    params = init_params(kp, nlayers, d_model, heads, d_k, d_v, d_ff)

    memory_bank = jax.random.normal(km, (B, Tsrc, d_model), jnp.float32)
    tgt_emb = jax.random.normal(kt, (B, Ttgt, d_model), jnp.float32)
    memory_len = jnp.array([12, 9], jnp.int32)
    tgt_len = jnp.array([8, 6], jnp.int32)
    tgt_pad_mask = jnp.arange(Ttgt)[None, :] >= tgt_len[:, None]   # True at pad positions

    reps, attns = decoder_forward(params, memory_bank, memory_len, tgt_pad_mask, tgt_emb,
                                  heads, d_k, d_v)

    out = jax.block_until_ready(reps[-1])
    assert out.shape == (B, Ttgt, d_model)
    assert attns["std"][-1].shape == (B, heads, Ttgt, Tsrc)
    assert bool(jnp.all(jnp.isfinite(out)))
    print("KERNEL_OK")
</pallas_src>

<mosaic_0001>
module attributes {stable_mosaic.version = 11 : i64} {
  func.func @_decoder_kernel(%arg0: i32, %arg1: i32, %arg2: memref<1x8x32xf32, #tpu.memory_space<vmem>>, %arg3: memref<1x12x32xf32, #tpu.memory_space<vmem>>, %arg4: memref<1x8x8xf32, #tpu.memory_space<vmem>>, %arg5: memref<1x1x12xf32, #tpu.memory_space<vmem>>, %arg6: memref<1x32x96xf32, #tpu.memory_space<vmem>>, %arg7: memref<1x1x96xf32, #tpu.memory_space<vmem>>, %arg8: memref<1x32x32xf32, #tpu.memory_space<vmem>>, %arg9: memref<1x1x32xf32, #tpu.memory_space<vmem>>, %arg10: memref<1x1x32xf32, #tpu.memory_space<vmem>>, %arg11: memref<1x1x32xf32, #tpu.memory_space<vmem>>, %arg12: memref<1x32x32xf32, #tpu.memory_space<vmem>>, %arg13: memref<1x1x32xf32, #tpu.memory_space<vmem>>, %arg14: memref<1x32x64xf32, #tpu.memory_space<vmem>>, %arg15: memref<1x1x64xf32, #tpu.memory_space<vmem>>, %arg16: memref<1x32x32xf32, #tpu.memory_space<vmem>>, %arg17: memref<1x1x32xf32, #tpu.memory_space<vmem>>, %arg18: memref<1x1x32xf32, #tpu.memory_space<vmem>>, %arg19: memref<1x1x32xf32, #tpu.memory_space<vmem>>, %arg20: memref<1x1x32xf32, #tpu.memory_space<vmem>>, %arg21: memref<1x1x32xf32, #tpu.memory_space<vmem>>, %arg22: memref<1x32x64xf32, #tpu.memory_space<vmem>>, %arg23: memref<1x1x64xf32, #tpu.memory_space<vmem>>, %arg24: memref<1x64x32xf32, #tpu.memory_space<vmem>>, %arg25: memref<1x1x32xf32, #tpu.memory_space<vmem>>, %arg26: memref<1x1x8x32xf32, #tpu.memory_space<vmem>>, %arg27: memref<1x1x16x12xf32, #tpu.memory_space<vmem>>, %arg28: memref<8x32xf32, #tpu.memory_space<vmem>>) attributes {dimension_semantics = [#tpu.dimension_semantics<parallel>, #tpu.dimension_semantics<arbitrary>], iteration_bounds = array<i64: 2, 2>, scalar_prefetch = 0 : i64, scratch_operands = 1 : i64, tpu.core_type = #tpu.core_type<tc>, window_params = [{transform_indices = @transform_0, window_bounds = array<i64: 1, 8, 32>}, {transform_indices = @transform_1, window_bounds = array<i64: 1, 12, 32>}, {transform_indices = @transform_2, window_bounds = array<i64: 1, 8, 8>}, {transform_indices = @transform_3, window_bounds = array<i64: 1, 1, 12>}, {transform_indices = @transform_4, window_bounds = array<i64: 1, 32, 96>}, {transform_indices = @transform_5, window_bounds = array<i64: 1, 1, 96>}, {transform_indices = @transform_6, window_bounds = array<i64: 1, 32, 32>}, {transform_indices = @transform_7, window_bounds = array<i64: 1, 1, 32>}, {transform_indices = @transform_8, window_bounds = array<i64: 1, 1, 32>}, {transform_indices = @transform_9, window_bounds = array<i64: 1, 1, 32>}, {transform_indices = @transform_10, window_bounds = array<i64: 1, 32, 32>}, {transform_indices = @transform_11, window_bounds = array<i64: 1, 1, 32>}, {transform_indices = @transform_12, window_bounds = array<i64: 1, 32, 64>}, {transform_indices = @transform_13, window_bounds = array<i64: 1, 1, 64>}, {transform_indices = @transform_14, window_bounds = array<i64: 1, 32, 32>}, {transform_indices = @transform_15, window_bounds = array<i64: 1, 1, 32>}, {transform_indices = @transform_16, window_bounds = array<i64: 1, 1, 32>}, {transform_indices = @transform_17, window_bounds = array<i64: 1, 1, 32>}, {transform_indices = @transform_18, window_bounds = array<i64: 1, 1, 32>}, {transform_indices = @transform_19, window_bounds = array<i64: 1, 1, 32>}, {transform_indices = @transform_20, window_bounds = array<i64: 1, 32, 64>}, {transform_indices = @transform_21, window_bounds = array<i64: 1, 1, 64>}, {transform_indices = @transform_22, window_bounds = array<i64: 1, 64, 32>}, {transform_indices = @transform_23, window_bounds = array<i64: 1, 1, 32>}, {transform_indices = @transform_24, window_bounds = array<i64: 1, 1, 8, 32>}, {transform_indices = @transform_25, window_bounds = array<i64: 1, 1, 16, 12>}]} {
    %c0_i32 = arith.constant 0 : i32
    %0 = arith.cmpi eq, %arg1, %c0_i32 : i32
    %1 = arith.extui %0 : i1 to i32
    %c0_i32_0 = arith.constant 0 : i32
    %2 = arith.cmpi ne, %1, %c0_i32_0 : i32
    scf.if %2 {
      %c0_128 = arith.constant 0 : index
      %c0_129 = arith.constant 0 : index
      %c0_130 = arith.constant 0 : index
      %234 = vector.load %arg2[%c0_128, %c0_129, %c0_130] : memref<1x8x32xf32, #tpu.memory_space<vmem>>, vector<1x8x32xf32>
      %235 = vector.shape_cast %234 : vector<1x8x32xf32> to vector<8x32xf32>
      %c0_131 = arith.constant 0 : index
      %c0_132 = arith.constant 0 : index
      %236 = vector.load %arg28[%c0_131, %c0_132] : memref<8x32xf32, #tpu.memory_space<vmem>>, vector<8x32xf32>
      tpu.vector_store %arg28[%c0_131, %c0_132], %235 {strides = array<i32>} : memref<8x32xf32, #tpu.memory_space<vmem>>, vector<8x32xf32>,
    } else {
    }
    %c0 = arith.constant 0 : index
    %c0_1 = arith.constant 0 : index
    %3 = vector.load %arg28[%c0, %c0_1] : memref<8x32xf32, #tpu.memory_space<vmem>>, vector<8x32xf32>
    %c0_2 = arith.constant 0 : index
    %c0_3 = arith.constant 0 : index
    %c0_4 = arith.constant 0 : index
    %4 = vector.load %arg3[%c0_2, %c0_3, %c0_4] : memref<1x12x32xf32, #tpu.memory_space<vmem>>, vector<1x12x32xf32>
    %5 = vector.shape_cast %4 : vector<1x12x32xf32> to vector<12x32xf32>
    %c0_5 = arith.constant 0 : index
    %c0_6 = arith.constant 0 : index
    %c0_7 = arith.constant 0 : index
    %6 = vector.load %arg6[%c0_5, %c0_6, %c0_7] : memref<1x32x96xf32, #tpu.memory_space<vmem>>, vector<1x32x96xf32>
    %7 = vector.shape_cast %6 : vector<1x32x96xf32> to vector<32x96xf32>
    %cst = arith.constant dense<0.000000e+00> : vector<8x96xf32>
    %8 = tpu.matmul %3, %7, %cst {dimension_numbers = #tpu.dot_dimension_numbers<[1], [0], [0], [1], [0, 0, 1, 1], [], []>} : vector<8x32xf32>, vector<32x96xf32>, vector<8x96xf32> -> vector<8x96xf32>
    %c0_8 = arith.constant 0 : index
    %c0_9 = arith.constant 0 : index
    %c0_10 = arith.constant 0 : index
    %9 = vector.load %arg7[%c0_8, %c0_9, %c0_10] : memref<1x1x96xf32, #tpu.memory_space<vmem>>, vector<1x1x96xf32>
    %10 = vector.shape_cast %9 : vector<1x1x96xf32> to vector<1x96xf32>
    %11 = vector.broadcast %10 : vector<1x96xf32> to vector<8x96xf32>
    %12 = arith.addf %8, %11 : vector<8x96xf32>
    %c0_11 = arith.constant 0 : index
    %c0_12 = arith.constant 0 : index
    %c0_13 = arith.constant 0 : index
    %13 = vector.load %arg4[%c0_11, %c0_12, %c0_13] : memref<1x8x8xf32, #tpu.memory_space<vmem>>, vector<1x8x8xf32>
    %14 = vector.shape_cast %13 : vector<1x8x8xf32> to vector<8x8xf32>
    %c0_14 = arith.constant 0 : index
    %c0_15 = arith.constant 0 : index
    %c0_16 = arith.constant 0 : index
    %15 = vector.load %arg8[%c0_14, %c0_15, %c0_16] : memref<1x32x32xf32, #tpu.memory_space<vmem>>, vector<1x32x32xf32>
    %16 = vector.shape_cast %15 : vector<1x32x32xf32> to vector<32x32xf32>
    %c0_17 = arith.constant 0 : index
    %c0_18 = arith.constant 0 : index
    %c0_19 = arith.constant 0 : index
    %17 = vector.load %arg9[%c0_17, %c0_18, %c0_19] : memref<1x1x32xf32, #tpu.memory_space<vmem>>, vector<1x1x32xf32>
    %18 = vector.shape_cast %17 : vector<1x1x32xf32> to vector<1x32xf32>
    %19 = vector.extract_strided_slice %12 {offsets = [0, 0], sizes = [8, 16], strides = [1, 1]} : vector<8x96xf32> to vector<8x16xf32>
    %cst_20 = arith.constant 2.500000e-01 : f32
    %20 = vector.broadcast %cst_20 : f32 to vector<8x16xf32>
    %21 = arith.mulf %19, %20 : vector<8x16xf32>
    %22 = vector.extract_strided_slice %12 {offsets = [0, 32], sizes = [8, 16], strides = [1, 1]} : vector<8x96xf32> to vector<8x16xf32>
    %23 = vector.extract_strided_slice %12 {offsets = [0, 64], sizes = [8, 16], strides = [1, 1]} : vector<8x96xf32> to vector<8x16xf32>
    "tpu.trace_start"() <{level = 10 : i32, message = "qd,kd->qk"}> : () -> ()
    %cst_21 = arith.constant dense<0.000000e+00> : vector<8x8xf32>
    %24 = tpu.matmul %21, %22, %cst_21 {dimension_numbers = #tpu.dot_dimension_numbers<[1], [1], [0], [0], [0, 0, 1, 0], [], []>} : vector<8x16xf32>, vector<8x16xf32>, vector<8x8xf32> -> vector<8x8xf32>
    "tpu.trace_stop"() : () -> ()
    %25 = arith.addf %24, %14 : vector<8x8xf32>
    %cst_22 = arith.constant dense<0xFF800000> : vector<8xf32>
    %26 = vector.multi_reduction <maximumf>, %25, %cst_22 [1] : vector<8x8xf32> to vector<8xf32>
    %27 = vector.shape_cast %26 : vector<8xf32> to vector<8x1xf32>
    %28 = vector.broadcast %27 : vector<8x1xf32> to vector<8x8xf32>
    %29 = arith.subf %25, %28 : vector<8x8xf32>
    %30 = math.exp %29 : vector<8x8xf32>
    %cst_23 = arith.constant dense<0.000000e+00> : vector<8xf32>
    %31 = vector.multi_reduction <add>, %30, %cst_23 [1] : vector<8x8xf32> to vector<8xf32>
    %32 = vector.shape_cast %31 : vector<8xf32> to vector<8x1xf32>
    %33 = tpu.reciprocal %32 {approx = true} : vector<8x1xf32> -> vector<8x1xf32>
    %34 = vector.broadcast %33 : vector<8x1xf32> to vector<8x8xf32>
    %35 = arith.mulf %30, %34 : vector<8x8xf32>
    %cst_24 = arith.constant dense<0.000000e+00> : vector<8x16xf32>
    %36 = tpu.matmul %35, %23, %cst_24 {dimension_numbers = #tpu.dot_dimension_numbers<[1], [0], [0], [1], [0, 0, 1, 1], [], []>} : vector<8x8xf32>, vector<8x16xf32>, vector<8x16xf32> -> vector<8x16xf32>
    %37 = vector.extract_strided_slice %16 {offsets = [0, 0], sizes = [16, 32], strides = [1, 1]} : vector<32x32xf32> to vector<16x32xf32>
    %cst_25 = arith.constant dense<0.000000e+00> : vector<8x32xf32>
    %38 = tpu.matmul %36, %37, %cst_25 {dimension_numbers = #tpu.dot_dimension_numbers<[1], [0], [0], [1], [0, 0, 1, 1], [], []>} : vector<8x16xf32>, vector<16x32xf32>, vector<8x32xf32> -> vector<8x32xf32>
    %39 = vector.broadcast %18 : vector<1x32xf32> to vector<8x32xf32>
    %40 = arith.addf %39, %38 : vector<8x32xf32>
    %41 = vector.extract_strided_slice %12 {offsets = [0, 16], sizes = [8, 16], strides = [1, 1]} : vector<8x96xf32> to vector<8x16xf32>
    %cst_26 = arith.constant 2.500000e-01 : f32
    %42 = vector.broadcast %cst_26 : f32 to vector<8x16xf32>
    %43 = arith.mulf %41, %42 : vector<8x16xf32>
    %44 = vector.extract_strided_slice %12 {offsets = [0, 48], sizes = [8, 16], strides = [1, 1]} : vector<8x96xf32> to vector<8x16xf32>
    %45 = vector.extract_strided_slice %12 {offsets = [0, 80], sizes = [8, 16], strides = [1, 1]} : vector<8x96xf32> to vector<8x16xf32>
    "tpu.trace_start"() <{level = 10 : i32, message = "qd,kd->qk"}> : () -> ()
    %cst_27 = arith.constant dense<0.000000e+00> : vector<8x8xf32>
    %46 = tpu.matmul %43, %44, %cst_27 {dimension_numbers = #tpu.dot_dimension_numbers<[1], [1], [0], [0], [0, 0, 1, 0], [], []>} : vector<8x16xf32>, vector<8x16xf32>, vector<8x8xf32> -> vector<8x8xf32>
    "tpu.trace_stop"() : () -> ()
    %47 = arith.addf %46, %14 : vector<8x8xf32>
    %cst_28 = arith.constant dense<0xFF800000> : vector<8xf32>
    %48 = vector.multi_reduction <maximumf>, %47, %cst_28 [1] : vector<8x8xf32> to vector<8xf32>
    %49 = vector.shape_cast %48 : vector<8xf32> to vector<8x1xf32>
    %50 = vector.broadcast %49 : vector<8x1xf32> to vector<8x8xf32>
    %51 = arith.subf %47, %50 : vector<8x8xf32>
    %52 = math.exp %51 : vector<8x8xf32>
    %cst_29 = arith.constant dense<0.000000e+00> : vector<8xf32>
    %53 = vector.multi_reduction <add>, %52, %cst_29 [1] : vector<8x8xf32> to vector<8xf32>
    %54 = vector.shape_cast %53 : vector<8xf32> to vector<8x1xf32>
    %55 = tpu.reciprocal %54 {approx = true} : vector<8x1xf32> -> vector<8x1xf32>
    %56 = vector.broadcast %55 : vector<8x1xf32> to vector<8x8xf32>
    %57 = arith.mulf %52, %56 : vector<8x8xf32>
    %cst_30 = arith.constant dense<0.000000e+00> : vector<8x16xf32>
    %58 = tpu.matmul %57, %45, %cst_30 {dimension_numbers = #tpu.dot_dimension_numbers<[1], [0], [0], [1], [0, 0, 1, 1], [], []>} : vector<8x8xf32>, vector<8x16xf32>, vector<8x16xf32> -> vector<8x16xf32>
    %59 = vector.extract_strided_slice %16 {offsets = [16, 0], sizes = [16, 32], strides = [1, 1]} : vector<32x32xf32> to vector<16x32xf32>
    %cst_31 = arith.constant dense<0.000000e+00> : vector<8x32xf32>
    %60 = tpu.matmul %58, %59, %cst_31 {dimension_numbers = #tpu.dot_dimension_numbers<[1], [0], [0], [1], [0, 0, 1, 1], [], []>} : vector<8x16xf32>, vector<16x32xf32>, vector<8x32xf32> -> vector<8x32xf32>
    %61 = arith.addf %40, %60 : vector<8x32xf32>
    %62 = arith.addf %61, %3 : vector<8x32xf32>
    %c0_32 = arith.constant 0 : index
    %c0_33 = arith.constant 0 : index
    %c0_34 = arith.constant 0 : index
    %63 = vector.load %arg10[%c0_32, %c0_33, %c0_34] : memref<1x1x32xf32, #tpu.memory_space<vmem>>, vector<1x1x32xf32>
    %64 = vector.shape_cast %63 : vector<1x1x32xf32> to vector<1x32xf32>
    %c0_35 = arith.constant 0 : index
    %c0_36 = arith.constant 0 : index
    %c0_37 = arith.constant 0 : index
    %65 = vector.load %arg11[%c0_35, %c0_36, %c0_37] : memref<1x1x32xf32, #tpu.memory_space<vmem>>, vector<1x1x32xf32>
    %66 = vector.shape_cast %65 : vector<1x1x32xf32> to vector<1x32xf32>
    %cst_38 = arith.constant dense<0.000000e+00> : vector<8xf32>
    %67 = vector.multi_reduction <add>, %62, %cst_38 [1] : vector<8x32xf32> to vector<8xf32>
    %68 = vector.shape_cast %67 : vector<8xf32> to vector<8x1xf32>
    %cst_39 = arith.constant 3.200000e+01 : f32
    %69 = vector.broadcast %cst_39 : f32 to vector<8x1xf32>
    %70 = arith.divf %68, %69 : vector<8x1xf32>
    %71 = vector.broadcast %70 : vector<8x1xf32> to vector<8x32xf32>
    %72 = arith.subf %62, %71 : vector<8x32xf32>
    %73 = arith.mulf %72, %72 : vector<8x32xf32>
    %cst_40 = arith.constant dense<0.000000e+00> : vector<8xf32>
    %74 = vector.multi_reduction <add>, %73, %cst_40 [1] : vector<8x32xf32> to vector<8xf32>
    %75 = vector.shape_cast %74 : vector<8xf32> to vector<8x1xf32>
    %cst_41 = arith.constant 3.200000e+01 : f32
    %76 = vector.broadcast %cst_41 : f32 to vector<8x1xf32>
    %77 = arith.divf %75, %76 : vector<8x1xf32>
    %78 = vector.broadcast %70 : vector<8x1xf32> to vector<8x32xf32>
    %79 = arith.subf %62, %78 : vector<8x32xf32>
    %cst_42 = arith.constant 9.99999997E-7 : f32
    %80 = vector.broadcast %cst_42 : f32 to vector<8x1xf32>
    %81 = arith.addf %77, %80 : vector<8x1xf32>
    %82 = math.rsqrt %81 : vector<8x1xf32>
    %83 = vector.broadcast %82 : vector<8x1xf32> to vector<8x32xf32>
    %84 = arith.mulf %79, %83 : vector<8x32xf32>
    %85 = vector.broadcast %64 : vector<1x32xf32> to vector<8x32xf32>
    %86 = arith.mulf %84, %85 : vector<8x32xf32>
    %87 = vector.broadcast %66 : vector<1x32xf32> to vector<8x32xf32>
    %88 = arith.addf %86, %87 : vector<8x32xf32>
    %c0_43 = arith.constant 0 : index
    %c0_44 = arith.constant 0 : index
    %c0_45 = arith.constant 0 : index
    %89 = vector.load %arg12[%c0_43, %c0_44, %c0_45] : memref<1x32x32xf32, #tpu.memory_space<vmem>>, vector<1x32x32xf32>
    %90 = vector.shape_cast %89 : vector<1x32x32xf32> to vector<32x32xf32>
    %cst_46 = arith.constant dense<0.000000e+00> : vector<8x32xf32>
    %91 = tpu.matmul %88, %90, %cst_46 {dimension_numbers = #tpu.dot_dimension_numbers<[1], [0], [0], [1], [0, 0, 1, 1], [], []>} : vector<8x32xf32>, vector<32x32xf32>, vector<8x32xf32> -> vector<8x32xf32>
    %c0_47 = arith.constant 0 : index
    %c0_48 = arith.constant 0 : index
    %c0_49 = arith.constant 0 : index
    %92 = vector.load %arg13[%c0_47, %c0_48, %c0_49] : memref<1x1x32xf32, #tpu.memory_space<vmem>>, vector<1x1x32xf32>
    %93 = vector.shape_cast %92 : vector<1x1x32xf32> to vector<1x32xf32>
    %94 = vector.broadcast %93 : vector<1x32xf32> to vector<8x32xf32>
    %95 = arith.addf %91, %94 : vector<8x32xf32>
    %c0_50 = arith.constant 0 : index
    %c0_51 = arith.constant 0 : index
    %c0_52 = arith.constant 0 : index
    %96 = vector.load %arg14[%c0_50, %c0_51, %c0_52] : memref<1x32x64xf32, #tpu.memory_space<vmem>>, vector<1x32x64xf32>
    %97 = vector.shape_cast %96 : vector<1x32x64xf32> to vector<32x64xf32>
    %cst_53 = arith.constant dense<0.000000e+00> : vector<12x64xf32>
    %98 = tpu.matmul %5, %97, %cst_53 {dimension_numbers = #tpu.dot_dimension_numbers<[1], [0], [0], [1], [0, 0, 1, 1], [], []>} : vector<12x32xf32>, vector<32x64xf32>, vector<12x64xf32> -> vector<12x64xf32>
    %c0_54 = arith.constant 0 : index
    %c0_55 = arith.constant 0 : index
    %c0_56 = arith.constant 0 : index
    %99 = vector.load %arg15[%c0_54, %c0_55, %c0_56] : memref<1x1x64xf32, #tpu.memory_space<vmem>>, vector<1x1x64xf32>
    %100 = vector.shape_cast %99 : vector<1x1x64xf32> to vector<1x64xf32>
    %101 = vector.broadcast %100 : vector<1x64xf32> to vector<12x64xf32>
    %102 = arith.addf %98, %101 : vector<12x64xf32>
    %c0_57 = arith.constant 0 : index
    %c0_58 = arith.constant 0 : index
    %c0_59 = arith.constant 0 : index
    %103 = vector.load %arg5[%c0_57, %c0_58, %c0_59] : memref<1x1x12xf32, #tpu.memory_space<vmem>>, vector<1x1x12xf32>
    %104 = vector.shape_cast %103 : vector<1x1x12xf32> to vector<1x12xf32>
    %c0_60 = arith.constant 0 : index
    %c0_61 = arith.constant 0 : index
    %c0_62 = arith.constant 0 : index
    %105 = vector.load %arg16[%c0_60, %c0_61, %c0_62] : memref<1x32x32xf32, #tpu.memory_space<vmem>>, vector<1x32x32xf32>
    %106 = vector.shape_cast %105 : vector<1x32x32xf32> to vector<32x32xf32>
    %c0_63 = arith.constant 0 : index
    %c0_64 = arith.constant 0 : index
    %c0_65 = arith.constant 0 : index
    %107 = vector.load %arg17[%c0_63, %c0_64, %c0_65] : memref<1x1x32xf32, #tpu.memory_space<vmem>>, vector<1x1x32xf32>
    %108 = vector.shape_cast %107 : vector<1x1x32xf32> to vector<1x32xf32>
    %109 = vector.extract_strided_slice %95 {offsets = [0, 0], sizes = [8, 16], strides = [1, 1]} : vector<8x32xf32> to vector<8x16xf32>
    %cst_66 = arith.constant 2.500000e-01 : f32
    %110 = vector.broadcast %cst_66 : f32 to vector<8x16xf32>
    %111 = arith.mulf %109, %110 : vector<8x16xf32>
    %112 = vector.extract_strided_slice %102 {offsets = [0, 0], sizes = [12, 16], strides = [1, 1]} : vector<12x64xf32> to vector<12x16xf32>
    %113 = vector.extract_strided_slice %102 {offsets = [0, 32], sizes = [12, 16], strides = [1, 1]} : vector<12x64xf32> to vector<12x16xf32>
    "tpu.trace_start"() <{level = 10 : i32, message = "qd,kd->qk"}> : () -> ()
    %cst_67 = arith.constant dense<0.000000e+00> : vector<8x12xf32>
    %114 = tpu.matmul %111, %112, %cst_67 {dimension_numbers = #tpu.dot_dimension_numbers<[1], [1], [0], [0], [0, 0, 1, 0], [], []>} : vector<8x16xf32>, vector<12x16xf32>, vector<8x12xf32> -> vector<8x12xf32>
    "tpu.trace_stop"() : () -> ()
    %115 = vector.broadcast %104 : vector<1x12xf32> to vector<8x12xf32>
    %116 = arith.addf %114, %115 : vector<8x12xf32>
    %cst_68 = arith.constant dense<0xFF800000> : vector<8xf32>
    %117 = vector.multi_reduction <maximumf>, %116, %cst_68 [1] : vector<8x12xf32> to vector<8xf32>
    %118 = vector.shape_cast %117 : vector<8xf32> to vector<8x1xf32>
    %119 = vector.broadcast %118 : vector<8x1xf32> to vector<8x12xf32>
    %120 = arith.subf %116, %119 : vector<8x12xf32>
    %121 = math.exp %120 : vector<8x12xf32>
    %cst_69 = arith.constant dense<0.000000e+00> : vector<8xf32>
    %122 = vector.multi_reduction <add>, %121, %cst_69 [1] : vector<8x12xf32> to vector<8xf32>
    %123 = vector.shape_cast %122 : vector<8xf32> to vector<8x1xf32>
    %124 = tpu.reciprocal %123 {approx = true} : vector<8x1xf32> -> vector<8x1xf32>
    %125 = vector.broadcast %124 : vector<8x1xf32> to vector<8x12xf32>
    %126 = arith.mulf %121, %125 : vector<8x12xf32>
    %c0_70 = arith.constant 0 : index
    %c0_71 = arith.constant 0 : index
    %c0_72 = arith.constant 0 : index
    %c0_73 = arith.constant 0 : index
    %127 = vector.load %arg27[%c0_70, %c0_71, %c0_72, %c0_73] : memref<1x1x16x12xf32, #tpu.memory_space<vmem>>, vector<1x1x8x12xf32>
    %128 = vector.shape_cast %127 : vector<1x1x8x12xf32> to vector<8x12xf32>
    %129 = vector.shape_cast %126 : vector<8x12xf32> to vector<1x1x8x12xf32>
    tpu.vector_store %arg27[%c0_70, %c0_71, %c0_72, %c0_73], %129 {strides = array<i32>} : memref<1x1x16x12xf32, #tpu.memory_space<vmem>>, vector<1x1x8x12xf32>,
    %cst_74 = arith.constant dense<0.000000e+00> : vector<8x16xf32>
    %130 = tpu.matmul %126, %113, %cst_74 {dimension_numbers = #tpu.dot_dimension_numbers<[1], [0], [0], [1], [0, 0, 1, 1], [], []>} : vector<8x12xf32>, vector<12x16xf32>, vector<8x16xf32> -> vector<8x16xf32>
    %131 = vector.extract_strided_slice %106 {offsets = [0, 0], sizes = [16, 32], strides = [1, 1]} : vector<32x32xf32> to vector<16x32xf32>
    %cst_75 = arith.constant dense<0.000000e+00> : vector<8x32xf32>
    %132 = tpu.matmul %130, %131, %cst_75 {dimension_numbers = #tpu.dot_dimension_numbers<[1], [0], [0], [1], [0, 0, 1, 1], [], []>} : vector<8x16xf32>, vector<16x32xf32>, vector<8x32xf32> -> vector<8x32xf32>
    %133 = vector.broadcast %108 : vector<1x32xf32> to vector<8x32xf32>
    %134 = arith.addf %133, %132 : vector<8x32xf32>
    %135 = vector.extract_strided_slice %95 {offsets = [0, 16], sizes = [8, 16], strides = [1, 1]} : vector<8x32xf32> to vector<8x16xf32>
    %cst_76 = arith.constant 2.500000e-01 : f32
    %136 = vector.broadcast %cst_76 : f32 to vector<8x16xf32>
    %137 = arith.mulf %135, %136 : vector<8x16xf32>
    %138 = vector.extract_strided_slice %102 {offsets = [0, 16], sizes = [12, 16], strides = [1, 1]} : vector<12x64xf32> to vector<12x16xf32>
    %139 = vector.extract_strided_slice %102 {offsets = [0, 48], sizes = [12, 16], strides = [1, 1]} : vector<12x64xf32> to vector<12x16xf32>
    "tpu.trace_start"() <{level = 10 : i32, message = "qd,kd->qk"}> : () -> ()
    %cst_77 = arith.constant dense<0.000000e+00> : vector<8x12xf32>
    %140 = tpu.matmul %137, %138, %cst_77 {dimension_numbers = #tpu.dot_dimension_numbers<[1], [1], [0], [0], [0, 0, 1, 0], [], []>} : vector<8x16xf32>, vector<12x16xf32>, vector<8x12xf32> -> vector<8x12xf32>
    "tpu.trace_stop"() : () -> ()
    %141 = vector.broadcast %104 : vector<1x12xf32> to vector<8x12xf32>
    %142 = arith.addf %140, %141 : vector<8x12xf32>
    %cst_78 = arith.constant dense<0xFF800000> : vector<8xf32>
    %143 = vector.multi_reduction <maximumf>, %142, %cst_78 [1] : vector<8x12xf32> to vector<8xf32>
    %144 = vector.shape_cast %143 : vector<8xf32> to vector<8x1xf32>
    %145 = vector.broadcast %144 : vector<8x1xf32> to vector<8x12xf32>
    %146 = arith.subf %142, %145 : vector<8x12xf32>
    %147 = math.exp %146 : vector<8x12xf32>
    %cst_79 = arith.constant dense<0.000000e+00> : vector<8xf32>
    %148 = vector.multi_reduction <add>, %147, %cst_79 [1] : vector<8x12xf32> to vector<8xf32>
    %149 = vector.shape_cast %148 : vector<8xf32> to vector<8x1xf32>
    %150 = tpu.reciprocal %149 {approx = true} : vector<8x1xf32> -> vector<8x1xf32>
    %151 = vector.broadcast %150 : vector<8x1xf32> to vector<8x12xf32>
    %152 = arith.mulf %147, %151 : vector<8x12xf32>
    %c0_80 = arith.constant 0 : index
    %c0_81 = arith.constant 0 : index
    %c8 = arith.constant 8 : index
    %c0_82 = arith.constant 0 : index
    %153 = vector.load %arg27[%c0_80, %c0_81, %c8, %c0_82] : memref<1x1x16x12xf32, #tpu.memory_space<vmem>>, vector<1x1x8x12xf32>
    %154 = vector.shape_cast %153 : vector<1x1x8x12xf32> to vector<8x12xf32>
    %155 = vector.shape_cast %152 : vector<8x12xf32> to vector<1x1x8x12xf32>
    tpu.vector_store %arg27[%c0_80, %c0_81, %c8, %c0_82], %155 {strides = array<i32>} : memref<1x1x16x12xf32, #tpu.memory_space<vmem>>, vector<1x1x8x12xf32>,
    %cst_83 = arith.constant dense<0.000000e+00> : vector<8x16xf32>
    %156 = tpu.matmul %152, %139, %cst_83 {dimension_numbers = #tpu.dot_dimension_numbers<[1], [0], [0], [1], [0, 0, 1, 1], [], []>} : vector<8x12xf32>, vector<12x16xf32>, vector<8x16xf32> -> vector<8x16xf32>
    %157 = vector.extract_strided_slice %106 {offsets = [16, 0], sizes = [16, 32], strides = [1, 1]} : vector<32x32xf32> to vector<16x32xf32>
    %cst_84 = arith.constant dense<0.000000e+00> : vector<8x32xf32>
    %158 = tpu.matmul %156, %157, %cst_84 {dimension_numbers = #tpu.dot_dimension_numbers<[1], [0], [0], [1], [0, 0, 1, 1], [], []>} : vector<8x16xf32>, vector<16x32xf32>, vector<8x32xf32> -> vector<8x32xf32>
    %159 = arith.addf %134, %158 : vector<8x32xf32>
    %160 = arith.addf %159, %88 : vector<8x32xf32>
    %c0_85 = arith.constant 0 : index
    %c0_86 = arith.constant 0 : index
    %c0_87 = arith.constant 0 : index
    %161 = vector.load %arg18[%c0_85, %c0_86, %c0_87] : memref<1x1x32xf32, #tpu.memory_space<vmem>>, vector<1x1x32xf32>
    %162 = vector.shape_cast %161 : vector<1x1x32xf32> to vector<1x32xf32>
    %c0_88 = arith.constant 0 : index
    %c0_89 = arith.constant 0 : index
    %c0_90 = arith.constant 0 : index
    %163 = vector.load %arg19[%c0_88, %c0_89, %c0_90] : memref<1x1x32xf32, #tpu.memory_space<vmem>>, vector<1x1x32xf32>
    %164 = vector.shape_cast %163 : vector<1x1x32xf32> to vector<1x32xf32>
    %cst_91 = arith.constant dense<0.000000e+00> : vector<8xf32>
    %165 = vector.multi_reduction <add>, %160, %cst_91 [1] : vector<8x32xf32> to vector<8xf32>
    %166 = vector.shape_cast %165 : vector<8xf32> to vector<8x1xf32>
    %cst_92 = arith.constant 3.200000e+01 : f32
    %167 = vector.broadcast %cst_92 : f32 to vector<8x1xf32>
    %168 = arith.divf %166, %167 : vector<8x1xf32>
    %169 = vector.broadcast %168 : vector<8x1xf32> to vector<8x32xf32>
    %170 = arith.subf %160, %169 : vector<8x32xf32>
    %171 = arith.mulf %170, %170 : vector<8x32xf32>
    %cst_93 = arith.constant dense<0.000000e+00> : vector<8xf32>
    %172 = vector.multi_reduction <add>, %171, %cst_93 [1] : vector<8x32xf32> to vector<8xf32>
    %173 = vector.shape_cast %172 : vector<8xf32> to vector<8x1xf32>
    %cst_94 = arith.constant 3.200000e+01 : f32
    %174 = vector.broadcast %cst_94 : f32 to vector<8x1xf32>
    %175 = arith.divf %173, %174 : vector<8x1xf32>
    %176 = vector.broadcast %168 : vector<8x1xf32> to vector<8x32xf32>
    %177 = arith.subf %160, %176 : vector<8x32xf32>
    %cst_95 = arith.constant 9.99999997E-7 : f32
    %178 = vector.broadcast %cst_95 : f32 to vector<8x1xf32>
    %179 = arith.addf %175, %178 : vector<8x1xf32>
    %180 = math.rsqrt %179 : vector<8x1xf32>
    %181 = vector.broadcast %180 : vector<8x1xf32> to vector<8x32xf32>
    %182 = arith.mulf %177, %181 : vector<8x32xf32>
    %183 = vector.broadcast %162 : vector<1x32xf32> to vector<8x32xf32>
    %184 = arith.mulf %182, %183 : vector<8x32xf32>
    %185 = vector.broadcast %164 : vector<1x32xf32> to vector<8x32xf32>
    %186 = arith.addf %184, %185 : vector<8x32xf32>
    %c0_96 = arith.constant 0 : index
    %c0_97 = arith.constant 0 : index
    %c0_98 = arith.constant 0 : index
    %187 = vector.load %arg20[%c0_96, %c0_97, %c0_98] : memref<1x1x32xf32, #tpu.memory_space<vmem>>, vector<1x1x32xf32>
    %188 = vector.shape_cast %187 : vector<1x1x32xf32> to vector<1x32xf32>
    %c0_99 = arith.constant 0 : index
    %c0_100 = arith.constant 0 : index
    %c0_101 = arith.constant 0 : index
    %189 = vector.load %arg21[%c0_99, %c0_100, %c0_101] : memref<1x1x32xf32, #tpu.memory_space<vmem>>, vector<1x1x32xf32>
    %190 = vector.shape_cast %189 : vector<1x1x32xf32> to vector<1x32xf32>
    %cst_102 = arith.constant dense<0.000000e+00> : vector<8xf32>
    %191 = vector.multi_reduction <add>, %186, %cst_102 [1] : vector<8x32xf32> to vector<8xf32>
    %192 = vector.shape_cast %191 : vector<8xf32> to vector<8x1xf32>
    %cst_103 = arith.constant 3.200000e+01 : f32
    %193 = vector.broadcast %cst_103 : f32 to vector<8x1xf32>
    %194 = arith.divf %192, %193 : vector<8x1xf32>
    %195 = vector.broadcast %194 : vector<8x1xf32> to vector<8x32xf32>
    %196 = arith.subf %186, %195 : vector<8x32xf32>
    %197 = arith.mulf %196, %196 : vector<8x32xf32>
    %cst_104 = arith.constant dense<0.000000e+00> : vector<8xf32>
    %198 = vector.multi_reduction <add>, %197, %cst_104 [1] : vector<8x32xf32> to vector<8xf32>
    %199 = vector.shape_cast %198 : vector<8xf32> to vector<8x1xf32>
    %cst_105 = arith.constant 3.200000e+01 : f32
    %200 = vector.broadcast %cst_105 : f32 to vector<8x1xf32>
    %201 = arith.divf %199, %200 : vector<8x1xf32>
    %202 = vector.broadcast %194 : vector<8x1xf32> to vector<8x32xf32>
    %203 = arith.subf %186, %202 : vector<8x32xf32>
    %cst_106 = arith.constant 9.99999997E-7 : f32
    %204 = vector.broadcast %cst_106 : f32 to vector<8x1xf32>
    %205 = arith.addf %201, %204 : vector<8x1xf32>
    %206 = math.rsqrt %205 : vector<8x1xf32>
    %207 = vector.broadcast %206 : vector<8x1xf32> to vector<8x32xf32>
    %208 = arith.mulf %203, %207 : vector<8x32xf32>
    %209 = vector.broadcast %188 : vector<1x32xf32> to vector<8x32xf32>
    %210 = arith.mulf %208, %209 : vector<8x32xf32>
    %211 = vector.broadcast %190 : vector<1x32xf32> to vector<8x32xf32>
    %212 = arith.addf %210, %211 : vector<8x32xf32>
    %c0_107 = arith.constant 0 : index
    %c0_108 = arith.constant 0 : index
    %c0_109 = arith.constant 0 : index
    %213 = vector.load %arg22[%c0_107, %c0_108, %c0_109] : memref<1x32x64xf32, #tpu.memory_space<vmem>>, vector<1x32x64xf32>
    %214 = vector.shape_cast %213 : vector<1x32x64xf32> to vector<32x64xf32>
    %cst_110 = arith.constant dense<0.000000e+00> : vector<8x64xf32>
    %215 = tpu.matmul %212, %214, %cst_110 {dimension_numbers = #tpu.dot_dimension_numbers<[1], [0], [0], [1], [0, 0, 1, 1], [], []>} : vector<8x32xf32>, vector<32x64xf32>, vector<8x64xf32> -> vector<8x64xf32>
    %c0_111 = arith.constant 0 : index
    %c0_112 = arith.constant 0 : index
    %c0_113 = arith.constant 0 : index
    %216 = vector.load %arg23[%c0_111, %c0_112, %c0_113] : memref<1x1x64xf32, #tpu.memory_space<vmem>>, vector<1x1x64xf32>
    %217 = vector.shape_cast %216 : vector<1x1x64xf32> to vector<1x64xf32>
    %218 = vector.broadcast %217 : vector<1x64xf32> to vector<8x64xf32>
    %219 = arith.addf %215, %218 : vector<8x64xf32>
    %cst_114 = arith.constant 0.000000e+00 : f32
    %220 = vector.broadcast %cst_114 : f32 to vector<8x64xf32>
    %221 = arith.maximumf %219, %220 : vector<8x64xf32>
    %c0_115 = arith.constant 0 : index
    %c0_116 = arith.constant 0 : index
    %c0_117 = arith.constant 0 : index
    %222 = vector.load %arg24[%c0_115, %c0_116, %c0_117] : memref<1x64x32xf32, #tpu.memory_space<vmem>>, vector<1x64x32xf32>
    %223 = vector.shape_cast %222 : vector<1x64x32xf32> to vector<64x32xf32>
    %cst_118 = arith.constant dense<0.000000e+00> : vector<8x32xf32>
    %224 = tpu.matmul %221, %223, %cst_118 {dimension_numbers = #tpu.dot_dimension_numbers<[1], [0], [0], [1], [0, 0, 1, 1], [], []>} : vector<8x64xf32>, vector<64x32xf32>, vector<8x32xf32> -> vector<8x32xf32>
    %c0_119 = arith.constant 0 : index
    %c0_120 = arith.constant 0 : index
    %c0_121 = arith.constant 0 : index
    %225 = vector.load %arg25[%c0_119, %c0_120, %c0_121] : memref<1x1x32xf32, #tpu.memory_space<vmem>>, vector<1x1x32xf32>
    %226 = vector.shape_cast %225 : vector<1x1x32xf32> to vector<1x32xf32>
    %227 = vector.broadcast %226 : vector<1x32xf32> to vector<8x32xf32>
    %228 = arith.addf %224, %227 : vector<8x32xf32>
    %229 = arith.addf %228, %186 : vector<8x32xf32>
    %c0_122 = arith.constant 0 : index
    %c0_123 = arith.constant 0 : index
    %230 = vector.load %arg28[%c0_122, %c0_123] : memref<8x32xf32, #tpu.memory_space<vmem>>, vector<8x32xf32>
    tpu.vector_store %arg28[%c0_122, %c0_123], %229 {strides = array<i32>} : memref<8x32xf32, #tpu.memory_space<vmem>>, vector<8x32xf32>,
    %c0_124 = arith.constant 0 : index
    %c0_125 = arith.constant 0 : index
    %c0_126 = arith.constant 0 : index
    %c0_127 = arith.constant 0 : index
    %231 = vector.load %arg26[%c0_124, %c0_125, %c0_126, %c0_127] : memref<1x1x8x32xf32, #tpu.memory_space<vmem>>, vector<1x1x8x32xf32>
    %232 = vector.shape_cast %231 : vector<1x1x8x32xf32> to vector<8x32xf32>
    %233 = vector.shape_cast %229 : vector<8x32xf32> to vector<1x1x8x32xf32>
    tpu.vector_store %arg26[%c0_124, %c0_125, %c0_126, %c0_127], %233 {strides = array<i32>} : memref<1x1x8x32xf32, #tpu.memory_space<vmem>>, vector<1x1x8x32xf32>,
    return
  }
  func.func @transform_0(%arg0: i32, %arg1: i32) -> (i32, i32, i32) {
    %c0_i32 = arith.constant 0 : i32
    %c0_i32_0 = arith.constant 0 : i32
    %c0_i32_1 = arith.constant 0 : i32
    return %arg0, %c0_i32, %c0_i32_0 : i32, i32, i32
  }
  func.func @transform_1(%arg0: i32, %arg1: i32) -> (i32, i32, i32) {
    %c0_i32 = arith.constant 0 : i32
    %c0_i32_0 = arith.constant 0 : i32
    %c0_i32_1 = arith.constant 0 : i32
    return %arg0, %c0_i32, %c0_i32_0 : i32, i32, i32
  }
  func.func @transform_2(%arg0: i32, %arg1: i32) -> (i32, i32, i32) {
    %c0_i32 = arith.constant 0 : i32
    %c0_i32_0 = arith.constant 0 : i32
    %c0_i32_1 = arith.constant 0 : i32
    return %arg0, %c0_i32, %c0_i32_0 : i32, i32, i32
  }
  func.func @transform_3(%arg0: i32, %arg1: i32) -> (i32, i32, i32) {
    %c0_i32 = arith.constant 0 : i32
    %c0_i32_0 = arith.constant 0 : i32
    %c0_i32_1 = arith.constant 0 : i32
    return %arg0, %c0_i32, %c0_i32_0 : i32, i32, i32
  }
  func.func @transform_4(%arg0: i32, %arg1: i32) -> (i32, i32, i32) {
    %c0_i32 = arith.constant 0 : i32
    %c0_i32_0 = arith.constant 0 : i32
    %c0_i32_1 = arith.constant 0 : i32
    return %arg1, %c0_i32, %c0_i32_0 : i32, i32, i32
  }
  func.func @transform_5(%arg0: i32, %arg1: i32) -> (i32, i32, i32) {
    %c0_i32 = arith.constant 0 : i32
    %c0_i32_0 = arith.constant 0 : i32
    %c0_i32_1 = arith.constant 0 : i32
    return %arg1, %c0_i32, %c0_i32_0 : i32, i32, i32
  }
  func.func @transform_6(%arg0: i32, %arg1: i32) -> (i32, i32, i32) {
    %c0_i32 = arith.constant 0 : i32
    %c0_i32_0 = arith.constant 0 : i32
    %c0_i32_1 = arith.constant 0 : i32
    return %arg1, %c0_i32, %c0_i32_0 : i32, i32, i32
  }
  func.func @transform_7(%arg0: i32, %arg1: i32) -> (i32, i32, i32) {
    %c0_i32 = arith.constant 0 : i32
    %c0_i32_0 = arith.constant 0 : i32
    %c0_i32_1 = arith.constant 0 : i32
    return %arg1, %c0_i32, %c0_i32_0 : i32, i32, i32
  }
  func.func @transform_8(%arg0: i32, %arg1: i32) -> (i32, i32, i32) {
    %c0_i32 = arith.constant 0 : i32
    %c0_i32_0 = arith.constant 0 : i32
    %c0_i32_1 = arith.constant 0 : i32
    return %arg1, %c0_i32, %c0_i32_0 : i32, i32, i32
  }
  func.func @transform_9(%arg0: i32, %arg1: i32) -> (i32, i32, i32) {
    %c0_i32 = arith.constant 0 : i32
    %c0_i32_0 = arith.constant 0 : i32
    %c0_i32_1 = arith.constant 0 : i32
    return %arg1, %c0_i32, %c0_i32_0 : i32, i32, i32
  }
  func.func @transform_10(%arg0: i32, %arg1: i32) -> (i32, i32, i32) {
    %c0_i32 = arith.constant 0 : i32
    %c0_i32_0 = arith.constant 0 : i32
    %c0_i32_1 = arith.constant 0 : i32
    return %arg1, %c0_i32, %c0_i32_0 : i32, i32, i32
  }
  func.func @transform_11(%arg0: i32, %arg1: i32) -> (i32, i32, i32) {
    %c0_i32 = arith.constant 0 : i32
    %c0_i32_0 = arith.constant 0 : i32
    %c0_i32_1 = arith.constant 0 : i32
    return %arg1, %c0_i32, %c0_i32_0 : i32, i32, i32
  }
  func.func @transform_12(%arg0: i32, %arg1: i32) -> (i32, i32, i32) {
    %c0_i32 = arith.constant 0 : i32
    %c0_i32_0 = arith.constant 0 : i32
    %c0_i32_1 = arith.constant 0 : i32
    return %arg1, %c0_i32, %c0_i32_0 : i32, i32, i32
  }
  func.func @transform_13(%arg0: i32, %arg1: i32) -> (i32, i32, i32) {
    %c0_i32 = arith.constant 0 : i32
    %c0_i32_0 = arith.constant 0 : i32
    %c0_i32_1 = arith.constant 0 : i32
    return %arg1, %c0_i32, %c0_i32_0 : i32, i32, i32
  }
  func.func @transform_14(%arg0: i32, %arg1: i32) -> (i32, i32, i32) {
    %c0_i32 = arith.constant 0 : i32
    %c0_i32_0 = arith.constant 0 : i32
    %c0_i32_1 = arith.constant 0 : i32
    return %arg1, %c0_i32, %c0_i32_0 : i32, i32, i32
  }
  func.func @transform_15(%arg0: i32, %arg1: i32) -> (i32, i32, i32) {
    %c0_i32 = arith.constant 0 : i32
    %c0_i32_0 = arith.constant 0 : i32
    %c0_i32_1 = arith.constant 0 : i32
    return %arg1, %c0_i32, %c0_i32_0 : i32, i32, i32
  }
  func.func @transform_16(%arg0: i32, %arg1: i32) -> (i32, i32, i32) {
    %c0_i32 = arith.constant 0 : i32
    %c0_i32_0 = arith.constant 0 : i32
    %c0_i32_1 = arith.constant 0 : i32
    return %arg1, %c0_i32, %c0_i32_0 : i32, i32, i32
  }
  func.func @transform_17(%arg0: i32, %arg1: i32) -> (i32, i32, i32) {
    %c0_i32 = arith.constant 0 : i32
    %c0_i32_0 = arith.constant 0 : i32
    %c0_i32_1 = arith.constant 0 : i32
    return %arg1, %c0_i32, %c0_i32_0 : i32, i32, i32
  }
  func.func @transform_18(%arg0: i32, %arg1: i32) -> (i32, i32, i32) {
    %c0_i32 = arith.constant 0 : i32
    %c0_i32_0 = arith.constant 0 : i32
    %c0_i32_1 = arith.constant 0 : i32
    return %arg1, %c0_i32, %c0_i32_0 : i32, i32, i32
  }
  func.func @transform_19(%arg0: i32, %arg1: i32) -> (i32, i32, i32) {
    %c0_i32 = arith.constant 0 : i32
    %c0_i32_0 = arith.constant 0 : i32
    %c0_i32_1 = arith.constant 0 : i32
    return %arg1, %c0_i32, %c0_i32_0 : i32, i32, i32
  }
  func.func @transform_20(%arg0: i32, %arg1: i32) -> (i32, i32, i32) {
    %c0_i32 = arith.constant 0 : i32
    %c0_i32_0 = arith.constant 0 : i32
    %c0_i32_1 = arith.constant 0 : i32
    return %arg1, %c0_i32, %c0_i32_0 : i32, i32, i32
  }
  func.func @transform_21(%arg0: i32, %arg1: i32) -> (i32, i32, i32) {
    %c0_i32 = arith.constant 0 : i32
    %c0_i32_0 = arith.constant 0 : i32
    %c0_i32_1 = arith.constant 0 : i32
    return %arg1, %c0_i32, %c0_i32_0 : i32, i32, i32
  }
  func.func @transform_22(%arg0: i32, %arg1: i32) -> (i32, i32, i32) {
    %c0_i32 = arith.constant 0 : i32
    %c0_i32_0 = arith.constant 0 : i32
    %c0_i32_1 = arith.constant 0 : i32
    return %arg1, %c0_i32, %c0_i32_0 : i32, i32, i32
  }
  func.func @transform_23(%arg0: i32, %arg1: i32) -> (i32, i32, i32) {
    %c0_i32 = arith.constant 0 : i32
    %c0_i32_0 = arith.constant 0 : i32
    %c0_i32_1 = arith.constant 0 : i32
    return %arg1, %c0_i32, %c0_i32_0 : i32, i32, i32
  }
  func.func @transform_24(%arg0: i32, %arg1: i32) -> (i32, i32, i32, i32) {
    %c0_i32 = arith.constant 0 : i32
    %c0_i32_0 = arith.constant 0 : i32
    %c0_i32_1 = arith.constant 0 : i32
    return %arg1, %arg0, %c0_i32, %c0_i32_0 : i32, i32, i32, i32
  }
  func.func @transform_25(%arg0: i32, %arg1: i32) -> (i32, i32, i32, i32) {
    %c0_i32 = arith.constant 0 : i32
    %c0_i32_0 = arith.constant 0 : i32
    %c0_i32_1 = arith.constant 0 : i32
    return %arg1, %arg0, %c0_i32, %c0_i32_0 : i32, i32, i32, i32
  }
}

</mosaic_0001>

<bundles_post_ra>
// kernel: tpu_custom_call.1
= control target key start
LH: loop header
LB: loop body
LE: loop exit
PB: predicated region body
PF: predicated region fallthrough
CT: control target
= control target key end

     0   :  { %s4206_s0 = inlined_call_operand.hbm [shape: f32[2,8,32], index: 0, kind: input, shape index: {}]   ;;  %s4207_s1 = inlined_call_operand.vmem [shape: f32[2,12,32], index: 1, kind: input, shape index: {}]   ;;  %s4208_s2 = inlined_call_operand.hbm [shape: f32[2,8,8], index: 2, kind: input, shape index: {}]   ;;  %s4209_s3 = inlined_call_operand.hbm [shape: f32[2,1,12], index: 3, kind: input, shape index: {}]   ;;  %s4210_s4 = inlined_call_operand.vmem [shape: f32[2,32,96], index: 4, kind: input, shape index: {}]   ;;  %s4211_s5 = inlined_call_operand.hbm [shape: f32[2,1,96], index: 5, kind: input, shape index: {}]   ;;  %s4212_s6 = inlined_call_operand.vmem [shape: f32[2,32,32], index: 6, kind: input, shape index: {}]   ;;  %s4213_s7 = inlined_call_operand.hbm [shape: f32[2,1,32], index: 7, kind: input, shape index: {}]   ;;  %s4214_s8 = inlined_call_operand.hbm [shape: f32[2,1,32], index: 8, kind: input, shape index: {}]   ;;  %s4215_s9 = inlined_call_operand.hbm [shape: f32[2,1,32], index: 9, kind: input, shape index: {}]   ;;  %s4216_s10 = inlined_call_operand.vmem [shape: f32[2,32,32], index: 10, kind: input, shape index: {}]   ;;  %s4217_s11 = inlined_call_operand.hbm [shape: f32[2,1,32], index: 11, kind: input, shape index: {}]   ;;  %s4218_s12 = inlined_call_operand.vmem [shape: f32[2,32,64], index: 12, kind: input, shape index: {}]   ;;  %s4219_s13 = inlined_call_operand.vmem [shape: f32[2,1,64], index: 13, kind: input, shape index: {}]   ;;  %s4220_s14 = inlined_call_operand.hbm [shape: f32[2,32,32], index: 14, kind: input, shape index: {}]   ;;  %s4221_s15 = inlined_call_operand.vmem [shape: f32[2,1,32], index: 15, kind: input, shape index: {}]   ;;  %s4222_s16 = inlined_call_operand.vmem [shape: f32[2,1,32], index: 16, kind: input, shape index: {}]   ;;  %s4223_s17 = inlined_call_operand.hbm [shape: f32[2,1,32], index: 17, kind: input, shape index: {}]   ;;  %s4224_s18 = inlined_call_operand.vmem [shape: f32[2,1,32], index: 18, kind: input, shape index: {}]   ;;  %s4225_s19 = inlined_call_operand.hbm [shape: f32[2,1,32], index: 19, kind: input, shape index: {}]   ;;  %s4226_s20 = inlined_call_operand.hbm [shape: f32[2,32,64], index: 20, kind: input, shape index: {}]   ;;  %s4227_s21 = inlined_call_operand.vmem [shape: f32[2,1,64], index: 21, kind: input, shape index: {}]   ;;  %s4228_s22 = inlined_call_operand.vmem [shape: f32[2,64,32], index: 22, kind: input, shape index: {}]   ;;  %s4229_s23 = inlined_call_operand.vmem [shape: f32[2,1,32], index: 23, kind: input, shape index: {}]   ;;  %s4230_s24 = inlined_call_operand.hbm [shape: f32[2,2,8,32], index: 24, kind: output, shape index: {0}]   ;;  %s4231_s25 = inlined_call_operand.vmem [shape: f32[2,2,16,12], index: 25, kind: output, shape index: {1}]  }
   0x1   :  { %4268 = sst [smem:[#allocation58_spill]] %s4206_s0 }
   0x2   :  { %4269 = sst [smem:[#allocation59_spill]] %s4207_s1 }
   0x3   :  { %4270 = sst [smem:[#allocation60_spill]] %s4208_s2 }
   0x4   :  { %4271 = sst [smem:[#allocation61_spill]] %s4209_s3 }
   0x5   :  { %4272 = sst [smem:[#allocation62_spill]] %s4210_s4 }
   0x6   :  { %4273 = sst [smem:[#allocation63_spill]] %s4211_s5 }
   0x7   :  { %4274 = sst [smem:[#allocation64_spill]] %s4212_s6 }
   0x8   :  { %4275 = sst [smem:[#allocation65_spill]] %s4213_s7 }
   0x9   :  { %4276 = sst [smem:[#allocation66_spill]] %s4214_s8 }
   0xa   :  { %4277 = sst [smem:[#allocation67_spill]] %s4215_s9 }
   0xb   :  { %4278 = sst [smem:[#allocation68_spill]] %s4216_s10 }
   0xc   :  { %4279 = sst [smem:[#allocation69_spill]] %s4217_s11 }
   0xd   :  { %4280 = sst [smem:[#allocation70_spill]] %s4218_s12 }
   0xe   :  { %4281 = sst [smem:[#allocation71_spill]] %s4219_s13 }
   0xf   :  { %4282 = sst [smem:[#allocation72_spill]] %s4220_s14 }
  0x10   :  { %4283 = sst [smem:[#allocation73_spill]] %s4221_s15 }
  0x11   :  { %4284 = sst [smem:[#allocation74_spill]] %s4222_s16 }
  0x12   :  { %4285 = sst [smem:[#allocation75_spill]] %s4223_s17 }
  0x13   :  { %4286 = sst [smem:[#allocation76_spill]] %s4224_s18 }
  0x14   :  { %4287 = sst [smem:[#allocation77_spill]] %s4225_s19 }
  0x15   :  { %4288 = sst [smem:[#allocation78_spill]] %s4226_s20 }
  0x16   :  { %4289 = sst [smem:[#allocation79_spill]] %s4227_s21 }
  0x17   :  { %4290 = sst [smem:[#allocation80_spill]] %s4228_s22 }
  0x18   :  { %4291 = sst [smem:[#allocation81_spill]] %s4229_s23 }
  0x19   :  { %4292 = sst [smem:[#allocation82_spill]] %s4230_s24 }
  0x1a   :  { %4293 = sst [smem:[#allocation83_spill]] %s4231_s25 }
  0x1b   :  { %31 = vsyncpa [#allocation4], 0 }
  0x1c   :  { %33 = vsyncpa [#allocation4 + $0x1], 0 }
  0x1d   :  { %34 = vsyncpa [#allocation7], 0 }
  0x1e   :  { %36 = vsyncpa [#allocation7 + $0x1], 0 }
  0x1f   :  { %37 = vsyncpa [#allocation10], 0 }
  0x20   :  { %39 = vsyncpa [#allocation10 + $0x1], 0 }
  0x21   :  { %40 = vsyncpa [#allocation13], 0 }
  0x22   :  { %42 = vsyncpa [#allocation13 + $0x1], 0 }
  0x23   :  { %43 = vsyncpa [#allocation16], 0 }
  0x24   :  { %45 = vsyncpa [#allocation16 + $0x1], 0 }
  0x25   :  { %46 = vsyncpa [#allocation19], 0 }
  0x26   :  { %48 = vsyncpa [#allocation19 + $0x1], 0 }
  0x27   :  { %49 = vsyncpa [#allocation22], 0 }
  0x28   :  { %51 = vsyncpa [#allocation22 + $0x1], 0 }
  0x29   :  { %52 = vsyncpa [#allocation5], 0 }
  0x2a   :  { %54 = vsyncpa [#allocation5 + $0x1], 0  ;;  %s3553_s29 = smov 0   ;;  %s3555_s2 = smov 0  }
  0x2b   :  { %s3557_s6 = smov 0   ;;  %s3559_s30 = smov 0  }
  0x2c   :  { %s3561_s7 = smov 0   ;;  %s3563_s3 = smov 0  }
  0x2d   :  { %s3565_s26 = smov 0   ;;  %s3567_s1 = smov 0  }
  0x2e   :  { %s3569_s8 = smov 0   ;;  %s3571_s27 = smov 0  }
  0x2f   :  { %s3573_s4 = smov 0   ;;  %s3575_s28 = smov 0  }
  0x30   :  { %s3577_s9 = smov 0   ;;  %s3579_s5 = smov 0  }
  0x31 LB: > { %4294 = sst [smem:[#allocation32_spill]] %s3361_s29  ;;  %s3622_s0 = sadd.s32 4294967295, %s3413_s5   ;;  %s3413_s5 = sphi %s3579_s5, %s60_s5   ;;  %s3409_s9 = sphi %s3577_s9, %s4410_s9   ;;  %s3405_s28 = sphi %s3575_s28, %s4409_s28   ;;  %s3401_s4 = sphi %s3573_s4, %s4408_s4   ;;  %s3397_s27 = sphi %s3571_s27, %s4407_s27   ;;  %s3393_s8 = sphi %s3569_s8, %s4406_s8   ;;  %s3389_s1 = sphi %s3567_s1, %s4405_s1   ;;  %s3385_s26 = sphi %s3565_s26, %s4404_s26   ;;  %s3381_s3 = sphi %s3563_s3, %s4403_s3   ;;  %s3377_s7 = sphi %s3561_s7, %s4402_s7   ;;  %s3373_s30 = sphi %s3559_s30, %s4401_s30   ;;  %s3369_s6 = sphi %s3557_s6, %s4400_s6   ;;  %s3365_s2 = sphi %s3555_s2, %s4399_s2   ;;  %s3361_s29 = sphi %s3553_s29, %s4398_s29  }
  0x32   : > { %4295 = sst [smem:[#allocation33_spill]] %s3365_s2  ;;  %s69_s25 = sadd.s32 1, %s3405_s28 }
  0x33   : > { %4296 = sst [smem:[#allocation34_spill]] %s3369_s6  ;;  %s72_s23 = sadd.s32 1, %s3409_s9 }
  0x34   : > { %4297 = sst [smem:[#allocation35_spill]] %s3377_s7  ;;  %p70_p0 = scmp.ge.s32.totalorder %s69_s25, 2 }
  0x35   : > { %4298 = sst [smem:[#allocation36_spill]] %s3381_s3  ;;  %s79_s22 = sadd.s32 1, %s3393_s8 }
  0x36   : > { %4299 = sst [smem:[#allocation37_spill]] %s3389_s1  ;;  %p86_p1 = scmp.ne.s32.totalorder %s3393_s8, %s3389_s1 }
  0x37   : > { %4300 = sst [smem:[#allocation38_spill]] %s3393_s8  ;;  %p87_p2 = scmp.eq.s32.totalorder %s3413_s5, 0 }
  0x38   : > { %4301 = sst [smem:[#allocation39_spill]] %s3397_s27  ;;  %s4412_s25 = smov (%p70_p0, %s69_s25), 0 }
  0x39   : > { %4302 = sst [smem:[#allocation40_spill]] %s3401_s4  ;;  %s4414_s23 = smov (!%p70_p0, %s72_s23), %s3409_s9 }
  0x3a   : > { %4303 = sst [smem:[#allocation41_spill]] %s3405_s28  ;;  %p3636_p3 = por %p87_p2, %p86_p1 }
  0x3b   : > { %4304 = sst [smem:[#allocation42_spill]] %s3409_s9  ;;  %p92_p4 = scmp.ne.s32.totalorder %s3389_s1, %s3385_s26 }
  0x3c   : > { %4305 = sst [smem:[#allocation43_spill]] %s3413_s5  ;;  %p74_p5 = scmp.ge.s32.totalorder %s4414_s23, 2 }
  0x3d   : > { %4306 = sst [smem:[#allocation44_spill]] %s4412_s25  ;;  %p93_p6 = scmp.eq.s32.totalorder %s3622_s0, 0 }
  0x3e   : > { %s206_s21 = ssub.s32 %s3405_s28, %s4412_s25  ;;  %s209_s18 = sadd.s32 1, %s3381_s3 }
  0x3f   : > { %s4416_s23 = smov (%p74_p5, %s4414_s23), 0  ;;  %p3649_p7 = por %p93_p6, %p92_p4 }
  0x40   : > { %4308 = sst [smem:[#allocation45_spill]] %s4416_s23  ;;  %p207_p8 = scmp.eq.s32.totalorder %s206_s21, 0 }
  0x41   : > { %s76_s26 = ssub.s32 %s3409_s9, %s4416_s23  ;;  %p216_p9 = scmp.ne.s32.totalorder %s3381_s3, %s3377_s7 }
  0x42   : > { %p77_p10 = scmp.eq.s32.totalorder %s76_s26, 0  ;;  %p222_p11 = scmp.ne.s32.totalorder %s3377_s7, %s3373_s30 }
  0x43   : > { %s3660_s25 = scalar_select %p207_p8, %s3381_s3, %s209_s18  }
  0x44   : > { %s3663_s15 = scalar_select %p77_p10, %s3393_s8, %s79_s22  }
  0x45   : > { %4310 = sst [smem:[#allocation46_spill]] %s3660_s25  ;;  %p3667_p12 = por %p216_p9, %p87_p2 }
  0x46   : > { %4311 = sst [smem:[#allocation47_spill]] %s3663_s15  ;;  %p3673_p13 = por %p222_p11, %p93_p6 }
  0x47   : > { %s702_s30 = sor.u32 %s206_s21, %s76_s26  ;;  %s705_s18 = sadd.s32 1, %s3369_s6 }
  0x48   : > { %s4313_s23 = scalar_select %p3673_p13, 1, 0 }
  0x49   : > { %p703_p0 = scmp.eq.s32.totalorder %s702_s30, 0  ;;  %p715_p1 = scmp.ne.s32.totalorder %s3369_s6, %s3365_s2 }
  0x4a   : > { %4314 = sst [smem:[#allocation48_spill]] %s4313_s23  ;;  %p716_p4 = scmp.eq.s32.totalorder %s3622_s0, 3 }
  0x4b   : > { %p721_p5 = scmp.ne.s32.totalorder %s3365_s2, %s3361_s29  ;;  %s4318_s25 = sadd.s32 4294967294, %s3413_s5  }
  0x4c   : > { %s3684_s22 = scalar_select %p703_p0, %s3369_s6, %s705_s18  }
  0x4d   : > { %p3686_p2 = por %p716_p4, %p715_p1  ;;  %p722_p8 = scmp.eq.s32.totalorder %s4318_s25, 3 }
  0x4e   : > { %4315 = sst [smem:[#allocation49_spill]] %s3684_s22  ;;  %p2723_p6 = scmp.lt.s32.totalorder %s3413_s5, 4 }
  0x4f   : > { %s4316_s15 = scalar_select %p3686_p2, 1, 0 }
  0x50   : > { %p3693_p9 = por %p722_p8, %p721_p5  ;;  %s3698_s26 = sand.u32 1, %s3393_s8  }
  0x51   : > { %4317 = sst [smem:[#allocation50_spill]] %s4316_s15  ;;  %s4243_s30 = sshll.u32 %s3698_s26, 3 }
  0x52   : > { %s4319_s21 = scalar_select %p3693_p9, 1, 0 }
  0x53   : > { %s4244_s18 = sshll.u32 %s3409_s9, 3  ;;  %p3706_p10 = pnand %p2723_p6, %p3636_p3 }
  0x54   : > { %4320 = sst [smem:[#allocation51_spill]] %s4319_s21  ;;  %s3711_s22 = sand.u32 1, %s3413_s5  }
  0x55   : > { %s4322_s8 = sld [smem:[#allocation60_spill]]  ;;  %s801_s12 = scalar_lea.vmem [#allocation6], %s4243_s30 }
  0x56   : > { %s809_s24 = sshll.u32 %s801_s12, 4  ;;  %s4242_s10 = scalar_lea.sflag [#allocation7], %s3711_s22  ;;  %s810_s24 = int_to_ptr.vmem [resolvable:$true] %s809_s24 }
  0x57   : > { %s3726_s27 = sand.u32 1, %s3381_s3   ;;  %p3732_p3 = pnand %p2723_p6, %p3667_p12 }
  0x58   : > { %p2595_p11 = scmp.ge.s32.totalorder %s3413_s5, 1  ;;  %p1070_p0 = scmp.lt.s32.totalorder %s3413_s5, 5 }
  0x59   : > { %s844_s21 = scalar_lea.vmem [#allocation9], %s3726_s27  ;;  %s4251_s30 = scalar_lea.sflag [#allocation10], %s3711_s22 }
  0x5a   : > { %p3738_p1 = pnand %p2595_p11, %p1070_p0  ;;  %s4326_s5 = sld [smem:[#allocation66_spill]] }
  0x5b   : > { %s805_s29 = scalar_lea.hbm %s4322_s8, %s4244_s18  ;;  %s4325_s8 = sld [smem:[#allocation63_spill]] }
  0x5c   : > { %s807_s15 = sshll.u32 %s805_s29, 4  ;;  %s4327_s11 = sld [smem:[#allocation69_spill]]  ;;  %s808_s15 = int_to_ptr.hbm [resolvable:$true] %s807_s15 }
  0x5d   : > { %2688 = dma.hbm_to_vmem [thread:$0]  (!%p3706_p10), %s808_s15, 128, %s810_s24, %s4242_s10  }
  0x5e   : > { %s851_s24 = sshll.u32 %s844_s21, 4  ;;  %s4328_s17 = sld [smem:[#allocation75_spill]]  ;;  %s852_s24 = int_to_ptr.vmem [resolvable:$true] %s851_s24 }
  0x5f   : > { %s4336_s25 = sld [smem:[#allocation67_spill]] }
  0x60   : > { %s889_s6 = scalar_lea.hbm %s4326_s5, %s3405_s28  ;;  %s928_s5 = scalar_lea.vmem [#allocation15], %s3726_s27 }
  0x61   : > { %s847_s13 = scalar_lea.hbm %s4325_s8, %s3405_s28  ;;  %s891_s15 = sshll.u32 %s889_s6, 4  ;;  %s892_s15 = int_to_ptr.hbm [resolvable:$true] %s891_s15 }
  0x62   : > { %s849_s10 = sshll.u32 %s847_s13, 4  ;;  %s886_s8 = scalar_lea.vmem [#allocation12], %s3726_s27  ;;  %s850_s10 = int_to_ptr.hbm [resolvable:$true] %s849_s10 }
  0x63   : > { %2694 = dma.hbm_to_vmem [thread:$0]  (!%p3732_p3), %s850_s10, 16, %s852_s24, %s4251_s30  }
  0x64   : > { %s893_s4 = sshll.u32 %s886_s8, 4  ;;  %s4249_s13 = scalar_lea.sflag [#allocation13], %s3711_s22  ;;  %s894_s4 = int_to_ptr.vmem [resolvable:$true] %s893_s4 }
  0x65   : > { %2700 = dma.hbm_to_vmem [thread:$0]  (!%p3732_p3), %s892_s15, 16, %s894_s4, %s4249_s13  }
  0x66   : > { %s931_s3 = scalar_lea.hbm %s4327_s11, %s3405_s28  ;;  %s935_s18 = sshll.u32 %s928_s5, 4  ;;  %s936_s18 = int_to_ptr.vmem [resolvable:$true] %s935_s18 }
  0x67   : > { %s933_s24 = sshll.u32 %s931_s3, 4  ;;  %s4250_s6 = scalar_lea.sflag [#allocation16], %s3711_s22  ;;  %s934_s24 = int_to_ptr.hbm [resolvable:$true] %s933_s24 }
  0x68   : > { %2706 = dma.hbm_to_vmem [thread:$0]  (!%p3732_p3), %s934_s24, 16, %s936_s18, %s4250_s6  }
  0x69   : > { %s996_s15 = scalar_lea.hbm %s4328_s17, %s3405_s28  ;;  %s993_s10 = scalar_lea.vmem [#allocation18], %s3726_s27 }
  0x6a   : > { %s998_s21 = sshll.u32 %s996_s15, 4  ;;  %s1000_s13 = sshll.u32 %s993_s10, 4  ;;  %s999_s21 = int_to_ptr.hbm [resolvable:$true] %s998_s21  ;;  %s1001_s13 = int_to_ptr.vmem [resolvable:$true] %s1000_s13 }
  0x6b   : > { %s4252_s3 = scalar_lea.sflag [#allocation19], %s3711_s22  ;;  %s4329_s5 = sshll.u32 %s3409_s9, 3 }
  0x6c   : > { %2712 = dma.hbm_to_vmem [thread:$0]  (!%p3732_p3), %s999_s21, 16, %s1001_s13, %s4252_s3  }
  0x6d   : > { %s4330_s6 = sld [smem:[#allocation58_spill]]  ;;  %s4331_s4 = sshll.u32 %s3698_s26, 3 }
  0x6e   : > { %s774_s15 = scalar_lea.vmem [#allocation3], %s4331_s4  ;;  %s771_s10 = scalar_lea.sflag [#allocation4], %s3698_s26 }
  0x6f   : > { %s782_s30 = sshll.u32 %s774_s15, 4  ;;  %s4332_s3 = sld [smem:[#allocation61_spill]]  ;;  %s783_s30 = int_to_ptr.vmem [resolvable:$true] %s782_s30 }
  0x70   : > { %s819_s24 = scalar_lea.vmem [#allocation8], %s3698_s26  ;;  %s4334_s17 = sld [smem:[#allocation65_spill]] }
  0x71   : > { %s4335_s26 = scalar_lea.sflag [#allocation10], %s3711_s22  ;;  %s2648_s4 = sshll.u32 %s3405_s28, 5 }
  0x72   : > { %s4338_s14 = sld [smem:[#allocation72_spill]]  ;;  %s3416_s21 = smov 8  }
  0x73   : > { %s778_s8 = scalar_lea.hbm %s4330_s6, %s4329_s5  ;;  %s826_s6 = sshll.u32 %s819_s24, 4  ;;  %s827_s6 = int_to_ptr.vmem [resolvable:$true] %s826_s6 }
  0x74   : > { %s780_s11 = sshll.u32 %s778_s8, 4  ;;  %s4333_s8 = scalar_lea.sflag [#allocation7], %s3711_s22  ;;  %s781_s11 = int_to_ptr.hbm [resolvable:$true] %s780_s11 }
  0x75   : > { %2685 = dma.hbm_to_vmem [thread:$0]  (!%p3706_p10), %s781_s11, 128, %s783_s30, %s771_s10  }
  0x76   : > { %s822_s18 = scalar_lea.hbm %s4332_s3, %s3409_s9  ;;  %s872_s11 = scalar_lea.hbm %s4334_s17, %s3405_s28 }
  0x77   : > { %s824_s5 = sshll.u32 %s822_s18, 4  ;;  %s869_s30 = scalar_lea.vmem [#allocation11], %s3726_s27  ;;  %s825_s5 = int_to_ptr.hbm [resolvable:$true] %s824_s5 }
  0x78   : > { %2691 = dma.hbm_to_vmem [thread:$0]  (!%p3706_p10), %s825_s5, 16, %s827_s6, %s4333_s8  }
  0x79   : > { %s876_s10 = sshll.u32 %s869_s30, 4  ;;  %s874_s13 = sshll.u32 %s872_s11, 4  ;;  %s877_s10 = int_to_ptr.vmem [resolvable:$true] %s876_s10  ;;  %s875_s13 = int_to_ptr.hbm [resolvable:$true] %s874_s13 }
  0x7a   : > { %2697 = dma.hbm_to_vmem [thread:$0]  (!%p3732_p3), %s875_s13, 16, %s877_s10, %s4335_s26  }
  0x7b   : > { %s906_s18 = scalar_lea.hbm %s4336_s25, %s3405_s28  ;;  %s903_s24 = scalar_lea.vmem [#allocation14], %s3726_s27 }
  0x7c   : > { %s910_s6 = sshll.u32 %s903_s24, 4  ;;  %s908_s5 = sshll.u32 %s906_s18, 4  ;;  %s911_s6 = int_to_ptr.vmem [resolvable:$true] %s910_s6  ;;  %s909_s5 = int_to_ptr.hbm [resolvable:$true] %s908_s5 }
  0x7d   : > { %s2589_s17 = sshll.u32 %s3726_s27, 5  ;;  %s4337_s8 = scalar_lea.sflag [#allocation13], %s3711_s22 }
  0x7e   : > { %2703 = dma.hbm_to_vmem [thread:$0]  (!%p3732_p3), %s909_s5, 16, %s911_s6, %s4337_s8  }
  0x7f   : > { %s965_s30 = scalar_lea.hbm %s4338_s14, %s2648_s4  ;;  %s960_s10 = scalar_lea.vmem [#allocation17], %s2589_s17 }
  0x80   : > { %s968_s13 = sshll.u32 %s960_s10, 4  ;;  %s966_s26 = sshll.u32 %s965_s30, 4  ;;  %s969_s13 = int_to_ptr.vmem [resolvable:$true] %s968_s13  ;;  %s967_s26 = int_to_ptr.hbm [resolvable:$true] %s966_s26 }
  0x81   : > { %s3415_s3 = smov 128   ;;  %s4339_s25 = scalar_lea.sflag [#allocation16], %s3711_s22 }
  0x82   : > { %2709 = dma.hbm_to_vmem [thread:$0]  (!%p3732_p3), %s967_s26, 512, %s969_s13, %s4339_s25, %s3415_s3, %s3415_s3, %s3416_s21  }
  0x83   : > { %s4340_s19 = sld [smem:[#allocation77_spill]]  ;;  %s1016_s5 = scalar_lea.vmem [#allocation20], %s3726_s27 }
  0x84   : > { %s1023_s8 = sshll.u32 %s1016_s5, 4  ;;  %s4341_s11 = scalar_lea.sflag [#allocation19], %s3711_s22  ;;  %s1024_s8 = int_to_ptr.vmem [resolvable:$true] %s1023_s8 }
  0x85   : > { %s4342_s20 = sld [smem:[#allocation78_spill]]  ;;  %s1034_s2 = scalar_lea.vmem [#allocation21], %s2589_s17 }
  0x86   : > { %s1042_s23 = sshll.u32 %s1034_s2, 4  ;;  %s1031_s13 = scalar_lea.sflag [#allocation22], %s3726_s27  ;;  %s1043_s23 = int_to_ptr.vmem [resolvable:$true] %s1042_s23 }
  0x89   : > { %s1019_s6 = scalar_lea.hbm %s4340_s19, %s3405_s28 }
  0x8a   : > { %s1021_s15 = sshll.u32 %s1019_s6, 4  ;;  %1074 = sbr.rel (%p3738_p1) target bundleno = 3474 (0xd92), region = 116  ;;  %s1022_s15 = int_to_ptr.hbm [resolvable:$true] %s1021_s15 }
  0x8b   : > { %2715 = dma.hbm_to_vmem [thread:$0]  (!%p3732_p3), %s1022_s15, 16, %s1024_s8, %s4341_s11  }
  0x8c   : > { %s1039_s14 = scalar_lea.hbm %s4342_s20, %s2648_s4 }
  0x8d   : > { %s1040_s9 = sshll.u32 %s1039_s14, 4  ;;  %s1041_s9 = int_to_ptr.hbm [resolvable:$true] %s1040_s9 }
  0x8e   : > { %2718 = dma.hbm_to_vmem [thread:$0]  (!%p3732_p3), %s1041_s9, 512, %s1043_s23, %s1031_s13, %s3415_s3, %s3415_s3, %s3416_s21  }
  0x8f   : > { %s3846_s26 = sand.u32 1, %s3389_s1  }
  0x90   : > { %4343 = sst [smem:[#allocation52_spill]] %s3846_s26  ;;  %s2596_s22 = sshll.u32 %s3846_s26, 3 }
  0x91   : > { %s1077_s25 = scalar_lea.sflag [#allocation4], %s3846_s26  ;;  %s3850_s4 = scalar_lea.vmem [#allocation3], %s2596_s22 }
  0x92   : > { %3328 = dma.done.wait (%p3649_p7), %s1077_s25, 128  }
  0x93   : > { %3330 = vsyncadd (%p3649_p7), %s1077_s25, 4294967168  ;;  %s1086_s14 = sand.u32 1, %s3622_s0   ;;  %s3857_s2 = scalar_lea.vmem [#allocation6], %s2596_s22 }
  0x94   : > { %s1087_s23 = scalar_lea.sflag [#allocation7], %s1086_s14 }
  0x95   : > { %3332 = dma.done.wait (%p3649_p7), %s1087_s23, 144  }
  0x96   : > { %3334 = vsyncadd (%p3649_p7), %s1087_s23, 4294967152  ;;  %s3864_s9 = sand.u32 1, %s3377_s7   ;;  %s1106_s12 = scalar_lea.sflag [#allocation10], %s1086_s14 }
  0x97   : > { %3336 = dma.done.wait (%p3673_p13), %s1106_s12, 32  }
  0x98   : > { %3338 = vsyncadd (%p3673_p13), %s1106_s12, 4294967264  ;;  %s1124_s16 = scalar_lea.sflag [#allocation13], %s1086_s14 }
  0x99   : > { %3340 = dma.done.wait (%p3673_p13), %s1124_s16, 32  }
  0x9a   : > { %3342 = vsyncadd (%p3673_p13), %s1124_s16, 4294967264  ;;  %s1142_s18 = scalar_lea.sflag [#allocation16], %s1086_s14 }
  0x9b   : > { %3344 = dma.done.wait (%p3673_p13), %s1142_s18, 528  }
  0x9c   : > { %3346 = vsyncadd (%p3673_p13), %s1142_s18, 4294966768  ;;  %s2598_s6 = sshll.u32 %s3864_s9, 5  ;;  %s1161_s8 = scalar_lea.sflag [#allocation19], %s1086_s14 }
  0x9d   : > { %s3885_s5 = scalar_lea.vmem [#allocation17], %s2598_s6 }
  0x9e   : > { %4345 = sst [smem:[#allocation53_spill]] %s3885_s5 }
  0x9f   : > { %3348 = dma.done.wait (%p3673_p13), %s1161_s8, 32  }
  0xa0   : > { %3350 = vsyncadd (%p3673_p13), %s1161_s8, 4294967264  ;;  %s1179_s30 = scalar_lea.sflag [#allocation22], %s3864_s9  ;;  %s3894_s10 = scalar_lea.vmem [#allocation21], %s2598_s6 }
  0xa1   : > { %4346 = sst [smem:[#allocation54_spill]] %s3894_s10 }
  0xa2   : > { %3352 = dma.done.wait (%p3673_p13), %s1179_s30, 512  }
  0xa3   : > { %3354 = vsyncadd (%p3673_p13), %s1179_s30, 4294966784  ;;  %s4347_s13 = sld [smem:[#allocation33_spill]] }
  0xa4   : > { %s4348_s22 = sld [smem:[#allocation40_spill]] }
  0xa5   : > { %s4349_s25 = sld [smem:[#allocation39_spill]] }
  0xa6   : > { %s4350_s8 = sld [smem:[#allocation59_spill]] }
  0xa7   : > { %s4352_s15 = sld [smem:[#allocation62_spill]] }
  0xa8   : > { %s4353_s3 = sld [smem:[#allocation64_spill]] }
  0xa9   : > { %s4258_s14 = sand.u32 1, %s4347_s13   ;;  %s4354_s20 = sld [smem:[#allocation68_spill]] }
  0xaa   : > { %p1354_p7 = scmp.lt.s32.totalorder %s4348_s22, 1  ;;  %s3904_s23 = sshll.u32 %s4258_s14, 3 }
  0xab   : > { %p1359_p12 = scmp.lt.s32.totalorder %s4349_s25, 1  ;;  %s4358_s11 = sld [smem:[#allocation71_spill]] }
  0xac   : > { %s4418_s22 = smov (!%p1354_p7, %s4348_s22), 1  ;;  %s4361_s17 = sld [smem:[#allocation76_spill]] }
  0xad   : > { %s3909_s12 = scalar_select %p1359_p12, %s4349_s25, 1 }
  0xae   : > { %s2650_s27 = sshll.u32 %s4418_s22, 4  ;;  %s2613_s16 = sshll.u32 %s4418_s22, 1 }
  0xaf   : > { %s3914_s30 = scalar_lea.vmem %s4350_s8, %s2650_s27  ;;  %s2651_s13 = sshll.u32 %s3909_s12, 5 }
  0xb0   : > { %4351 = sst [smem:[#allocation55_spill]] %s3914_s30  ;;  %s1363_s29 = scalar_lea.vmem %s4352_s15, %s2651_s13 }
  0xb1   : > { %s3923_s0 = scalar_lea.vmem %s4353_s3, %s2651_s13  ;;  %s3928_s22 = scalar_lea.vmem %s4354_s20, %s2651_s13 }
  0xb2   : > { %4355 = sst [smem:[#allocation56_spill]] %s3928_s22  ;;  %s1381_s15 = scalar_lea.vmem %s4358_s11, %s3909_s12 }
  0xb3   : > { %s4356_s27 = sld [smem:[#allocation70_spill]]  ;;  %s1390_s22 = scalar_lea.vmem %s4361_s17, %s3909_s12 }
  0xb4   : > { %s4363_s8 = sld [smem:[#allocation80_spill]]  ;;  %s2614_s10 = sshll.u32 %s3909_s12, 2 }
  0xb5   : > { %s4364_s21 = sld [smem:[#allocation81_spill]]  ;;  %s1408_s5 = sadd.s32 %s2614_s10, %s2613_s16 }
  0xb6   : > { %s2615_s3 = sshll.u32 %s1408_s5, 3  ;;  %s4365_s20 = sld [smem:[#allocation83_spill]] }
  0xb7   : > { %s1342_s30 = scalar_lea.vmem [#allocation23], %s3904_s23  ;;  %p2616_p13 = scmp.ne.s32.totalorder %s4349_s25, 0 }
  0xb9   : > { %s3933_s6 = scalar_lea.vmem %s4356_s27, %s2651_s13  ;;  %s4362_s13 = sld [smem:[#allocation79_spill]] }
  0xba   : > { %4357 = sst [smem:[#allocation57_spill]] %s3933_s6  ;;  %s2655_s27 = sshll.u32 %s3909_s12, 6 }
  0xbb   : > { %s3959_s11 = scalar_lea.vmem %s4363_s8, %s2655_s27  ;;  %s1401_s24 = scalar_lea.vmem %s4364_s21, %s3909_s12 }
  0xbc   : > { %s3969_s17 = scalar_lea.vmem %s4365_s20, %s2615_s3  ;;  %1414 = sbr.rel (%p2616_p13) target bundleno = 195 (0xc3), region = 168 }
  0xbf   : > { %s1393_s18 = scalar_lea.vmem %s4362_s13, %s3909_s12 }
  0xc1   : > { %v1415_v0 = vld [vmem:[%s3850_s4] sm:$0xff]  ;;  %vm1416_vm0 = vcmask 261120  }
  0xc2   : > { %1417 = vst.msk [vmem:[#allocation2] sm:$0xff] %vm1416_vm0, %v1415_v0 }
  0xc3 PF: > { %v1424_v1 = vld [vmem:[%s1363_s29 + $0x18] sm:$0xff]  ;;  %v1423_v2 = vld [vmem:[%s1363_s29 + $0x10] sm:$0xff]  ;;  %v1422_v3 = vld [vmem:[%s1363_s29 + $0x8] sm:$0xff]  ;;  %vm1429_vm1 = vcmask 261120   ;;  %s4366_s26 = scalar_lea.vmem [#allocation9], %s3864_s9  ;;  %s3417_s4 = smov 80  }
  0xc4   : > { %1445 = vmatpush.msra.mxu0 %v1424_v1  ;;  %v1421_v4 = vld [vmem:[%s1363_s29] sm:$0xff]  ;;  %s3418_s25 = smov 96   ;;  %s3419_s29 = smov 112   ;;  %vm1463_vm2 = vcmask 130048   ;;  %vm1489_vm3 = vcmask 64512   ;;  %v1455_v21 = vld [vmem:[%s3923_s0 + $0x8] sm:$0xff] }
  0xc5   : > { %v2845_v6 = vld [vmem:[%s4366_s26] ss:$0 sm:$0xff]  ;;  %s3420_s16 = smov 48   ;;  %v1457_v38 = vld [vmem:[%s3923_s0 + $0x18] sm:$0xff]  ;;  %s4367_s6 = sld [smem:[#allocation57_spill]]  ;;  %v1456_v42 = vld [vmem:[%s3923_s0 + $0x10] sm:$0xff] }
  0xc6   : > { %1446 = vmatpush.msra.mxu0 %v1423_v2  ;;  %v1453_v11 = vld [vmem:[%s3857_s2] sm:$0xff]  ;;  %s3421_s2 = smov 64   ;;  %s4368_s28 = scalar_lea.vmem [#allocation11], %s3864_s9  ;;  %v3422_v51 = vmov 32.0   ;;  %vm1790_vm8 = vcmask 97280   ;;  %vm1811_vm9 = vcmask 1043456  }
  0xc7   : > { %v1454_v28 = vld [vmem:[%s3923_s0] sm:$0xff]  ;;  %s4369_s13 = sld [smem:[#allocation55_spill]]  ;;  %s4373_s7 = scalar_lea.vmem [#allocation14], %s3864_s9  ;;  %vm2068_vm0 = vcmask 523264  }
  0xc8   : > { %1447 = vmatpush.msra.mxu0 %v1422_v3  ;;  %v2846_v45 = vld [vmem:[%s4368_s28] ss:$0 sm:$0xff]  ;;  %s4370_s0 = sld [smem:[#allocation56_spill]]  ;;  %s4375_s21 = scalar_lea.vmem [#allocation15], %s3864_s9 }
  0xc9   : > { %v3974_v5 = vld [vmem:[#allocation2] sm:$0xff]  ;;  %s4374_s14 = sld [smem:[#allocation52_spill]] }
  0xca   : > { %1448 = vmatpush.msra.mxu0 %v1421_v4  ;;  %s4377_s5 = sld [smem:[#allocation53_spill]] }
  0xcb   : > { %2617 = vmatmul.msk.f32.vlgmr.msra.gmra.mxu0 %vm1429_vm1, %v3974_v5  ;;  %v1717_v52 = vld [vmem:[%s4367_s6 + $0x18] sm:$0xff]  ;;  %v1716_v53 = vld [vmem:[%s4367_s6 + $0x10] sm:$0xff]  ;;  %v1715_v54 = vld [vmem:[%s4367_s6 + $0x8] sm:$0xff]  ;;  %s4378_s20 = sld [smem:[#allocation73_spill]] }
  0xcc   : > { %v1714_v56 = vld [vmem:[%s4367_s6] sm:$0xff]  ;;  %s4386_s27 = sld [smem:[#allocation39_spill]] }
  0xcd   : > { %v1419_v57 = vld [vmem:[%s4369_s13] sm:$0xff]  ;;  %v1420_v60 = vld [vmem:[%s4369_s13 + $0x8] sm:$0xf]  ;;  %s4387_s1 = sld [smem:[#allocation40_spill]] }
  0xcf   : > { %s4376_s10 = scalar_lea.vmem [#allocation8], %s4374_s14 }
  0xd1   : > { %s4379_s26 = scalar_lea.vmem %s4378_s20, %s3909_s12  ;;  %s4391_s20 = sld [smem:[#allocation82_spill]] }
  0xd7   : > { %s3263_s6 = scalar_lea.hbm %s4391_s20, 32 }
 0x148   : > { %v1450_v7 = vpop.f32.mrf.mxu0 }
 0x149   : > { %v1451_v8 = vadd.f32 %v2845_v6, %v1450_v7  ;;  %v1685_v6 = vld [vmem:[%s4370_s0 + $0x10] sm:$0xff]  ;;  %v1684_v7 = vld [vmem:[%s4370_s0 + $0x8] sm:$0xff] }
 0x14b   : > { %1556 = vrot.lane.b32.xlu2 %v1451_v8, %s3417_s4  ;;  %1461 = vrot.lane.b32.xlu0 %v1451_v8, %s3418_s25  ;;  %v1459_v9 = vmul.f32 0.25, %v1451_v8 }
 0x153   : > { %1554 = vrot.lane.b32.xlu2 %v1459_v9, %s3419_s29 }
 0x1a5   : > { %v1557_v24 = vpop.permute.xlu2 %1556 }
 0x1ad   : > { %v1555_v27 = vpop.permute.xlu2 %1554 }
 0x1bd   : > { %v1462_v10 = vpop.permute.xlu0 %1461 }
 0x1be   : > { %2618 = vmatpush.xpose.msk.msra.mxu3 %vm1463_vm2, %v1462_v10 }
 0x1c1   : > { %2619 = vmatmul.msk.f32.vlgmr.msra.gmra.mxu3 %vm1463_vm2, %v1459_v9  ;;  %v2849_v9 = vld [vmem:[%s1381_s15] ss:$0 sm:$0xff]  ;;  %s4372_s15 = scalar_lea.vmem [#allocation12], %s3864_s9 }
 0x1c2   : > { %1544 = vmatpush.msrb.mxu3 %v1455_v21 }
 0x1c4   : > { %1545 = vmatpush.msrb.mxu3 %v1454_v28 }
 0x1c6   : > { %1636 = vmatpush.msra.mxu3 %v1457_v38 }
 0x1c8   : > { %1637 = vmatpush.msra.mxu3 %v1456_v42 }
 0x244   : > { %v1486_v12 = vpop.f32.mrf.mxu3 }
 0x245   : > { %v1487_v13 = vadd.f32 %v1486_v12, %v1453_v11 }
 0x247   : > { %v1490_v14 = vsel %vm1489_vm3, %v1487_v13, -inf }
 0x248   : > { %1491 = vmax.xlane.f32.xlu0 %v1490_v14 }
 0x25c   : > { %1593 = vrot.lane.b32.xlu0 %v1451_v8, %s3420_s16 }
 0x2bb   : > { %v1492_v15 = vpop.xlane.xlu0 %1491 }
 0x2bc   : > { %v1493_v16 = vsub.f32 %v1487_v13, %v1492_v15 }
 0x2be   : > { %v1494_v17 = vmul.f32 1.442695, %v1493_v16 }
 0x2c0   : > { %2859 = vpow2.f32 %v1494_v17 }
 0x2c6   : > { %v2860_v18 = vpop.eup %2859 }
 0x2c7   : > { %v1496_v19 = vsel %vm1489_vm3, %v2860_v18, 0.0 }
 0x2c8   : > { %1497 = vadd.xlane.f32.xlu1 %v1496_v19 }
 0x2ce   : > { %v1594_v20 = vpop.permute.xlu0 %1593 }
 0x2cf   : > { %1614 = vmatpush.msra.mxu1 %v1594_v20 }
 0x2e1   : > { %1501 = vrot.lane.b32.xlu1 %v1451_v8, %s3421_s2  ;;  %v1683_v8 = vld [vmem:[%s4370_s0] sm:$0xff]  ;;  %s4383_s2 = scalar_lea.vmem [#allocation18], %s3864_s9 }
 0x33b   : > { %v1498_v22 = vpop.xlane.xlu1 %1497 }
 0x33c   : > { %2861 = vrcp.f32 %v1498_v22 }
 0x342   : > { %v2862_v23 = vpop.eup %2861 }
 0x343   : > { %v1500_v26 = vmul.f32 %v2862_v23, %v2860_v18  ;;  %v2847_v23 = vld [vmem:[%s4372_s15] ss:$0 sm:$0xff] }
 0x353   : > { %v1502_v25 = vpop.permute.xlu1 %1501 }
 0x354   : > { %1522 = vmatpush.msra.mxu2 %v1502_v25 }
 0x355   : > { %2620 = vmatmul.msk.f32.vlgmr.msra.gmra.mxu2 %vm1489_vm3, %v1500_v26  ;;  %v2848_v26 = vld [vmem:[%s4373_s7] ss:$0 sm:$0xff]  ;;  %s2644_s7 = sshll.u32 %s4386_s27, 1 }
 0x356   : > { %2622 = vmatpush.xpose.msk.msrb.mxu2 %vm1463_vm2, %v1557_v24  ;;  %s2115_s14 = sadd.s32 %s4387_s1, %s2644_s7 }
 0x35a   : > { %1740 = vmatpush.msra.mxu2 %v1717_v52 }
 0x35c   : > { %1741 = vmatpush.msra.mxu2 %v1716_v53 }
 0x35d   : > { %2623 = vmatmul.msk.f32.vlgmr.msrb.gmra.mxu2 %vm1463_vm2, %v1555_v27 }
 0x35e   : > { %1742 = vmatpush.msra.mxu2 %v1715_v54 }
 0x360   : > { %1743 = vmatpush.msra.mxu2 %v1714_v56 }
 0x365   : > { %2627 = vmatmul.msk.f32.vlgmr.msra.gmra.mxu2 %vm1429_vm1, %v1419_v57 }
 0x36d   : > { %2628 = vmatmul.msk.f32.gmra.mxu2 %vm1429_vm1, %v1420_v60  ;;  %v1752_v60 = vld [vmem:[%s4377_s5] sm:$0xff] }
 0x3d8   : > { %v1524_v29 = vpop.f32.mrf.mxu2 }
 0x3d9   : > { %2621 = vmatmul.msk.f32.vlgmr.msrb.gmra.mxu3 %vm1463_vm2, %v1524_v29 }
 0x3e0   : > { %v1579_v30 = vpop.f32.mrf.mxu2 }
 0x3e1   : > { %v1580_v31 = vadd.f32 %v1579_v30, %v1453_v11 }
 0x3e3   : > { %v1582_v32 = vsel %vm1489_vm3, %v1580_v31, -inf }
 0x3e4   : > { %1583 = vmax.xlane.f32.xlu2 %v1582_v32 }
 0x3e8   : > { %v1745_v10 = vpop.f32.mrf.mxu2 }
 0x3e9   : > { %v4025_v11 = vadd.f32 %v2849_v9, %v1745_v10 }
 0x3f0   : > { %v1748_v15 = vpop.f32.mrf.mxu2 }
 0x3f1   : > { %v1749_v16 = vadd.f32 %v2849_v9, %v1748_v15 }
 0x3f3   : > { %1865 = vrot.lane.b32.xlu0 %v1749_v16, %s3419_s29  ;;  %2629 = vmatpush.xpose.msk.msrb.mxu1 %vm1463_vm2, %v1749_v16 }
 0x3f7   : > { %2630 = vmatpush.xpose.msk.msrb.mxu1 %vm1463_vm2, %v4025_v11 }
 0x457   : > { %v1584_v33 = vpop.xlane.xlu2 %1583 }
 0x458   : > { %v1585_v34 = vsub.f32 %v1580_v31, %v1584_v33  ;;  %v2850_v31 = vld [vmem:[%s4375_s21] ss:$0 sm:$0xff]  ;;  %s2645_s21 = sshll.u32 %s2115_s14, 3 }
 0x45a   : > { %v1586_v35 = vmul.f32 1.442695, %v1585_v34 }
 0x45c   : > { %2863 = vpow2.f32 %v1586_v35  ;;  %v1547_v44 = vpop.f32.mrf.mxu3 }
 0x45d   : > { %v1553_v46 = vadd.f32 %v2846_v45, %v1547_v44 }
 0x462   : > { %v2864_v36 = vpop.eup %2863 }
 0x463   : > { %v1588_v37 = vsel %vm1489_vm3, %v2864_v36, 0.0 }
 0x464   : > { %1589 = vadd.xlane.f32.xlu1 %v1588_v37 }
 0x465   : > { %v1866_v29 = vpop.permute.xlu0 %1865 }
 0x4d7   : > { %v1590_v39 = vpop.xlane.xlu1 %1589 }
 0x4d8   : > { %2865 = vrcp.f32 %v1590_v39 }
 0x4d9   : > { %2867 = vrcp.f32 %v3422_v51 }
 0x4de   : > { %v2866_v40 = vpop.eup %2865 }
 0x4df   : > { %v1592_v41 = vmul.f32 %v2866_v40, %v2864_v36  ;;  %v2868_v55 = vpop.eup %2867  ;;  %v2851_v36 = vld [vmem:[%s4376_s10] ss:$0 sm:$0xff] }
 0x4e0   : > { %v1650_v58 = vmul.f32 32.0, %v2868_v55  ;;  %vm1654_vm4 = vweird.f32 %v2868_v55 }
 0x4e1   : > { %2624 = vmatmul.msk.f32.vlgmr.msra.gmra.mxu1 %vm1489_vm3, %v1592_v41 }
 0x4e2   : > { %v1651_v59 = vsub.f32 1.0, %v1650_v58  ;;  %2635 = vmatpush.xpose.msk.msra.mxu1 %vm1463_vm2, %v1866_v29 }
 0x4e4   : > { %v1652_v61 = vmul.f32 %v2868_v55, %v1651_v59  ;;  %v1753_v59 = vld [vmem:[%s4377_s5 + $0x8] sm:$0xff] }
 0x4e6   : > { %v1653_v62 = vadd.f32 %v2868_v55, %v1652_v61  ;;  %v1755_v61 = vld [vmem:[%s4377_s5 + $0x18] sm:$0xff] }
 0x4e8   : > { %v4012_v63 = vsel %vm1654_vm4, %v2868_v55, %v1653_v62 }
 0x55e   : > { %v1616_v43 = vpop.f32.mrf.mxu1 }
 0x55f   : > { %2625 = vmatmul.msk.f32.vlgmr.msra.gmra.mxu3 %vm1463_vm2, %v1616_v43 }
 0x5e2   : > { %v1639_v47 = vpop.f32.mrf.mxu3 }
 0x5e3   : > { %v1642_v48 = vadd.f32 %v1639_v47, %v1553_v46 }
 0x5e5   : > { %v1643_v49 = vadd.f32 %v1642_v48, %v3974_v5  ;;  %v1686_v5 = vld [vmem:[%s4370_s0 + $0x18] sm:$0xff]  ;;  %s4385_s0 = scalar_lea.vmem [#allocation20], %s3864_s9  ;;  %s4389_s9 = sld [smem:[#allocation33_spill]] }
 0x5e6   : > { %1706 = vmatpush.msrb.mxu0 %v1686_v5 }
 0x5e7   : > { %v1646_v50 = vsel %vm1429_vm1, %v1643_v49, 0.0 }
 0x5e8   : > { %1647 = vadd.xlane.f32.xlu2 %v1646_v50  ;;  %1707 = vmatpush.msrb.mxu0 %v1685_v6 }
 0x5ea   : > { %1708 = vmatpush.msrb.mxu0 %v1684_v7  ;;  %v2852_v7 = vld [vmem:[%s4379_s26] ss:$0 sm:$0xff] }
 0x5ec   : > { %1709 = vmatpush.msrb.mxu0 %v1683_v8 }
 0x5ee   : > { %1851 = vmatpush.msra.mxu0 %v1753_v59  ;;  %v2856_v59 = vld [vmem:[%s4385_s0] ss:$0 sm:$0xff] }
 0x5f0   : > { %1852 = vmatpush.msra.mxu0 %v1752_v60 }
 0x65b   : > { %v1648_v0 = vpop.xlane.xlu2 %1647 }
 0x65c   : > { %v1656_v1 = vmul.f32 %v4012_v63, %v1648_v0 }
 0x65e   : > { %v1657_v2 = vsub.f32 %v1643_v49, %v1656_v1 }
 0x660   : > { %v1658_v3 = vmul.f32 %v1657_v2, %v1657_v2 }
 0x662   : > { %v1659_v4 = vsel %vm1429_vm1, %v1658_v3, 0.0 }
 0x663   : > { %1660 = vadd.xlane.f32.xlu2 %v1659_v4  ;;  %v1754_v4 = vld [vmem:[%s4377_s5 + $0x10] sm:$0xff] }
 0x67b   : > { %1863 = vrot.lane.b32.xlu2 %v4025_v11, %s3419_s29 }
 0x6d6   : > { %v1661_v12 = vpop.xlane.xlu2 %1660 }
 0x6d7   : > { %v1662_v13 = vmul.f32 %v1661_v12, %v4012_v63 }
 0x6d9   : > { %v1663_v14 = vadd.f32 1e-06, %v1662_v13 }
 0x6db   : > { %2869 = vrsqrt.f32 %v1663_v14  ;;  %vm1670_vm6 = vweird.f32 %v1663_v14 }
 0x6de   : > { %v1864_v30 = vpop.permute.xlu2 %1863 }
 0x6df   : > { %2636 = vmatpush.xpose.msk.msra.mxu1 %vm1463_vm2, %v1864_v30  ;;  %v2854_v30 = vld [vmem:[%s4383_s2] ss:$0 sm:$0xff] }
 0x6e1   : > { %v2870_v17 = vpop.eup %2869 }
 0x6e2   : > { %v1665_v18 = vmul.f32 %v2870_v17, %v1663_v14  ;;  %vm1671_vm5 = vweird.f32 %v2870_v17 }
 0x6e3   : > { %vm1672_vm7 = vmor %vm1670_vm6, %vm1671_vm5 }
 0x6e4   : > { %v1666_v19 = vmul.f32 %v2870_v17, %v1665_v18 }
 0x6e6   : > { %v1667_v20 = vmul.f32 0.5, %v1666_v19 }
 0x6e8   : > { %v1668_v21 = vsub.f32 1.5, %v1667_v20 }
 0x6ea   : > { %v1669_v22 = vmul.f32 %v2870_v17, %v1668_v21 }
 0x6ec   : > { %v1673_v24 = vsel %vm1672_vm7, %v2870_v17, %v1669_v22 }
 0x6ed   : > { %v1674_v25 = vmul.f32 %v1673_v24, %v1657_v2 }
 0x6ef   : > { %v1678_v27 = vmul.f32 %v2847_v23, %v1674_v25 }
 0x6f1   : > { %v4038_v28 = vadd.f32 %v2848_v26, %v1678_v27 }
 0x6f3   : > { %2626 = vmatmul.msk.f32.vlgmr.msrb.gmra.mxu0 %vm1429_vm1, %v4038_v28 }
 0x6f4   : > { %1952 = vmatpush.msrb.mxu0 %v1755_v61 }
 0x6f6   : > { %1953 = vmatpush.msrb.mxu0 %v1754_v4 }
 0x770   : > { %v1711_v32 = vpop.f32.mrf.mxu0 }
 0x771   : > { %v1712_v33 = vadd.f32 %v2850_v31, %v1711_v32 }
 0x773   : > { %v1757_v34 = vmul.f32 0.25, %v1712_v33 }
 0x775   : > { %1861 = vrot.lane.b32.xlu1 %v1757_v34, %s3419_s29  ;;  %2631 = vmatmul.msk.f32.vlgmr.msrb.gmra.mxu1 %vm1463_vm2, %v1757_v34  ;;  %s4381_s29 = sld [smem:[#allocation74_spill]] }
 0x77b   : > { %s4382_s16 = scalar_lea.vmem %s4381_s29, %s3909_s12  ;;  %s4393_s12 = sand.u32 1, %s4389_s9  }
 0x77c   : > { %v2853_v27 = vld [vmem:[%s4382_s16] ss:$0 sm:$0xff] }
 0x7e7   : > { %v1862_v35 = vpop.permute.xlu1 %1861 }
 0x7e8   : > { %2637 = vmatmul.msk.f32.vlgmr.msra.gmra.mxu1 %vm1463_vm2, %v1862_v35 }
 0x7f2   : > { %v1787_v37 = vpop.f32.mrf.mxu1 }
 0x7f3   : > { %v1788_v38 = vadd.f32 %v2851_v36, %v1787_v37 }
 0x7f5   : > { %v1791_v39 = vsel %vm1790_vm8, %v1788_v38, -inf }
 0x7f6   : > { %1792 = vmax.xlane.f32.xlu0 %v1791_v39 }
 0x80a   : > { %1805 = vrot.lane.b32.xlu0 %v1749_v16, %s3418_s25 }
 0x812   : > { %1803 = vrot.lane.b32.xlu0 %v4025_v11, %s3418_s25 }
 0x865   : > { %v1890_v40 = vpop.f32.mrf.mxu1 }
 0x866   : > { %v1891_v41 = vadd.f32 %v2851_v36, %v1890_v40 }
 0x868   : > { %v1893_v42 = vsel %vm1790_vm8, %v1891_v41, -inf }
 0x869   : > { %1894 = vmax.xlane.f32.xlu2 %v1893_v42  ;;  %v1793_v43 = vpop.xlane.xlu0 %1792 }
 0x86a   : > { %v1794_v44 = vsub.f32 %v1788_v38, %v1793_v43  ;;  %v2063_v43 = vld [vmem:[%s3959_s11 + $0x38] sm:$0xff] }
 0x86b   : > { %2080 = vmatpush.msrb.mxu1 %v2063_v43 }
 0x86c   : > { %v1795_v45 = vmul.f32 1.442695, %v1794_v44  ;;  %v2062_v44 = vld [vmem:[%s3959_s11 + $0x30] sm:$0xff] }
 0x86d   : > { %2081 = vmatpush.msrb.mxu1 %v2062_v44 }
 0x86e   : > { %2871 = vpow2.f32 %v1795_v45  ;;  %v2061_v45 = vld [vmem:[%s3959_s11 + $0x28] sm:$0xff] }
 0x86f   : > { %2082 = vmatpush.msrb.mxu1 %v2061_v45 }
 0x874   : > { %v2872_v46 = vpop.eup %2871 }
 0x875   : > { %v1797_v47 = vsel %vm1790_vm8, %v2872_v46, 0.0 }
 0x876   : > { %1798 = vadd.xlane.f32.xlu1 %v1797_v47 }
 0x87c   : > { %v1806_v48 = vpop.permute.xlu0 %1805 }
 0x87d   : > { %2632 = vmatpush.msk.msrb.mxu3 %vm1811_vm9, %v1806_v48  ;;  %v2060_v48 = vld [vmem:[%s3959_s11 + $0x20] sm:$0xff] }
 0x87e   : > { %2083 = vmatpush.msrb.mxu1 %v2060_v48 }
 0x884   : > { %v1804_v49 = vpop.permute.xlu0 %1803 }
 0x885   : > { %1829 = vmatpush.msrb.mxu3 %v1804_v49 }
 0x88f   : > { %1907 = vrot.lane.b32.xlu1 %v1749_v16, %s3417_s4 }
 0x8dc   : > { %v1895_v50 = vpop.xlane.xlu2 %1894 }
 0x8dd   : > { %v1896_v51 = vsub.f32 %v1891_v41, %v1895_v50  ;;  %v2059_v50 = vld [vmem:[%s3959_s11 + $0x18] sm:$0xff] }
 0x8de   : > { %2084 = vmatpush.msrb.mxu1 %v2059_v50 }
 0x8df   : > { %v1897_v52 = vmul.f32 1.442695, %v1896_v51 }
 0x8e1   : > { %2873 = vpow2.f32 %v1897_v52 }
 0x8e7   : > { %v2874_v53 = vpop.eup %2873 }
 0x8e8   : > { %v1899_v54 = vsel %vm1790_vm8, %v2874_v53, 0.0 }
 0x8e9   : > { %1900 = vadd.xlane.f32.xlu2 %v1899_v54  ;;  %v1799_v55 = vpop.xlane.xlu1 %1798 }
 0x8ea   : > { %2875 = vrcp.f32 %v1799_v55 }
 0x8f0   : > { %v2876_v56 = vpop.eup %2875 }
 0x8f1   : > { %v1801_v57 = vmul.f32 %v2876_v56, %v2872_v46 }
 0x8f3   : > { %1802 = vst.msk [vmem:[%s3969_s17] sm:$0xff] %vm1790_vm8, %v1801_v57  ;;  %2633 = vmatmul.msk.f32.vlgmr.msrb.gmra.mxu3 %vm1790_vm8, %v1801_v57 }
 0x901   : > { %1905 = vrot.lane.b32.xlu2 %v4025_v11, %s3417_s4  ;;  %v1908_v58 = vpop.permute.xlu1 %1907 }
 0x902   : > { %2638 = vmatpush.msk.msra.mxu3 %vm1811_vm9, %v1908_v58 }
 0x95c   : > { %v1901_v62 = vpop.xlane.xlu2 %1900 }
 0x95d   : > { %2877 = vrcp.f32 %v1901_v62  ;;  %v2058_v62 = vld [vmem:[%s3959_s11 + $0x10] sm:$0xff] }
 0x95e   : > { %2085 = vmatpush.msrb.mxu1 %v2058_v62 }
 0x963   : > { %v2878_v0 = vpop.eup %2877 }
 0x964   : > { %v1903_v1 = vmul.f32 %v2878_v0, %v2874_v53  ;;  %v1906_v2 = vpop.permute.xlu2 %1905  ;;  %v2057_v0 = vld [vmem:[%s3959_s11 + $0x8] sm:$0xff] }
 0x965   : > { %1930 = vmatpush.msra.mxu3 %v1906_v2  ;;  %2086 = vmatpush.msrb.mxu1 %v2057_v0  ;;  %v2857_v2 = vld [vmem:[%s1393_s18] ss:$0 sm:$0xff]  ;;  %s2117_s18 = scalar_lea.hbm %s4391_s20, %s2645_s21 }
 0x966   : > { %1904 = vst.msk [vmem:[%s3969_s17 + $0x8] sm:$0xff] %vm1790_vm8, %v1903_v1  ;;  %2639 = vmatmul.msk.f32.vlgmr.msra.gmra.mxu3 %vm1790_vm8, %v1903_v1  ;;  %s4380_s17 = sld [smem:[#allocation54_spill]]  ;;  %v2056_v1 = vld [vmem:[%s3959_s11] sm:$0xff]  ;;  %s2121_s4 = sshll.u32 %s2117_s18, 4  ;;  %s2122_s4 = int_to_ptr.hbm [resolvable:$true] %s2121_s4 }
 0x967   : > { %2087 = vmatpush.msrb.mxu1 %v2056_v1  ;;  %s3257_s25 = sshra.s32 %s2122_s4, 4  ;;  %s3258_s25 = int_to_ptr.hbm [resolvable:$true] %s3257_s25 }
 0x968   : > { %s3259_s29 = scalar_lea.hbm %s3258_s25, 8  ;;  %p3264_p6 = scmp.lt.s32.totalorder %s3258_s25, %s4391_s20 }
 0x969   : > { %p3260_p4 = scmp.ne.s32.totalorder %s3258_s25, %s3259_s29  ;;  %p3265_p10 = scmp.lt.s32.totalorder %s3263_s6, %s3259_s29 }
 0x96b   : > { %p3261_p5 = pnand %p3260_p4, %p3686_p2  ;;  %p3266_p3 = por %p3265_p10, %p3264_p6 }
 0x96c   : > { %v2027_v39 = vld [vmem:[%s4380_s17 + $0x18] sm:$0xff]  ;;  %v2026_v40 = vld [vmem:[%s4380_s17 + $0x10] sm:$0xff]  ;;  %v2025_v41 = vld [vmem:[%s4380_s17 + $0x8] sm:$0xff] }
 0x96d   : > { %2047 = vmatpush.msrb.mxu2 %v2027_v39  ;;  %v2024_v42 = vld [vmem:[%s4380_s17] sm:$0xff]  ;;  %s2119_s17 = sshll.u32 %s1342_s30, 4  ;;  %p3262_p8 = pneg %p3261_p5  ;;  %s2120_s17 = int_to_ptr.vmem [resolvable:$true] %s2119_s17 }
 0x96f   : > { %2048 = vmatpush.msrb.mxu2 %v2026_v40  ;;  %p3267_p11 = pnand %p3266_p3, %p3262_p8 }
 0x971   : > { %2049 = vmatpush.msrb.mxu2 %v2025_v41 }
 0x973   : > { %2050 = vmatpush.msrb.mxu2 %v2024_v42 }
 0x976   : > { %v1831_v3 = vpop.f32.mrf.mxu3 }
 0x977   : > { %2634 = vmatmul.msk.f32.vlgmr.msra.gmra.mxu0 %vm1463_vm2, %v1831_v3 }
 0x9e9   : > { %v1932_v5 = vpop.f32.mrf.mxu3 }
 0x9ea   : > { %2640 = vmatmul.msk.f32.vlgmr.msrb.gmra.mxu0 %vm1463_vm2, %v1932_v5 }
 0x9f4   : > { %v1854_v6 = vpop.f32.mrf.mxu0 }
 0x9f5   : > { %v1860_v8 = vadd.f32 %v2852_v7, %v1854_v6  ;;  %v2858_v6 = vld [vmem:[%s1401_s24] ss:$0 sm:$0xff]  ;;  %s2096_s24 = scalar_lea.sflag [#allocation5], %s4393_s12 }
 0xa67   : > { %v1955_v9 = vpop.f32.mrf.mxu0 }
 0xa68   : > { %v1958_v10 = vadd.f32 %v1955_v9, %v1860_v8 }
 0xa6a   : > { %v1959_v11 = vadd.f32 %v1958_v10, %v4038_v28 }
 0xa6c   : > { %v1962_v12 = vsel %vm1429_vm1, %v1959_v11, 0.0 }
 0xa6d   : > { %1963 = vadd.xlane.f32.xlu0 %v1962_v12 }
 0xae0   : > { %v1964_v13 = vpop.xlane.xlu0 %1963 }
 0xae1   : > { %v1965_v14 = vmul.f32 %v1964_v13, %v4012_v63 }
 0xae3   : > { %v1966_v15 = vsub.f32 %v1959_v11, %v1965_v14 }
 0xae5   : > { %v1967_v16 = vmul.f32 %v1966_v15, %v1966_v15 }
 0xae7   : > { %v1968_v17 = vsel %vm1429_vm1, %v1967_v16, 0.0 }
 0xae8   : > { %1969 = vadd.xlane.f32.xlu1 %v1968_v17 }
 0xb5b   : > { %v1970_v18 = vpop.xlane.xlu1 %1969 }
 0xb5c   : > { %v1971_v19 = vmul.f32 %v1970_v18, %v4012_v63 }
 0xb5e   : > { %v1972_v20 = vadd.f32 1e-06, %v1971_v19 }
 0xb60   : > { %2879 = vrsqrt.f32 %v1972_v20  ;;  %vm1979_vm11 = vweird.f32 %v1972_v20 }
 0xb66   : > { %v2880_v21 = vpop.eup %2879 }
 0xb67   : > { %v1974_v22 = vmul.f32 %v2880_v21, %v1972_v20  ;;  %vm1980_vm10 = vweird.f32 %v2880_v21 }
 0xb68   : > { %vm1981_vm12 = vmor %vm1979_vm11, %vm1980_vm10 }
 0xb69   : > { %v1975_v23 = vmul.f32 %v2880_v21, %v1974_v22 }
 0xb6b   : > { %v1976_v24 = vmul.f32 0.5, %v1975_v23 }
 0xb6d   : > { %v1977_v25 = vsub.f32 1.5, %v1976_v24 }
 0xb6f   : > { %v1978_v26 = vmul.f32 %v2880_v21, %v1977_v25 }
 0xb71   : > { %v1982_v28 = vsel %vm1981_vm12, %v2880_v21, %v1978_v26 }
 0xb72   : > { %v1983_v29 = vmul.f32 %v1982_v28, %v1966_v15 }
 0xb74   : > { %v1987_v31 = vmul.f32 %v2853_v27, %v1983_v29 }
 0xb76   : > { %v4092_v32 = vadd.f32 %v2854_v30, %v1987_v31 }
 0xb78   : > { %v1994_v33 = vsel %vm1429_vm1, %v4092_v32, 0.0 }
 0xb79   : > { %1995 = vadd.xlane.f32.xlu2 %v1994_v33 }
 0xbec   : > { %v1996_v34 = vpop.xlane.xlu2 %1995 }
 0xbed   : > { %v1997_v35 = vmul.f32 %v1996_v34, %v4012_v63 }
 0xbef   : > { %v1998_v36 = vsub.f32 %v4092_v32, %v1997_v35 }
 0xbf1   : > { %v1999_v37 = vmul.f32 %v1998_v36, %v1998_v36 }
 0xbf3   : > { %v2000_v38 = vsel %vm1429_vm1, %v1999_v37, 0.0 }
 0xbf4   : > { %2001 = vadd.xlane.f32.xlu0 %v2000_v38 }
 0xc67   : > { %v2002_v46 = vpop.xlane.xlu0 %2001 }
 0xc68   : > { %v2003_v47 = vmul.f32 %v2002_v46, %v4012_v63  ;;  %v2855_v63 = vld [vmem:[%s1390_s22] ss:$0 sm:$0xff] }
 0xc6a   : > { %v2004_v49 = vadd.f32 1e-06, %v2003_v47 }
 0xc6c   : > { %2881 = vrsqrt.f32 %v2004_v49  ;;  %vm2011_vm14 = vweird.f32 %v2004_v49 }
 0xc72   : > { %v2882_v51 = vpop.eup %2881 }
 0xc73   : > { %v2006_v52 = vmul.f32 %v2882_v51, %v2004_v49  ;;  %vm2012_vm13 = vweird.f32 %v2882_v51 }
 0xc74   : > { %vm2013_vm15 = vmor %vm2011_vm14, %vm2012_vm13 }
 0xc75   : > { %v2007_v53 = vmul.f32 %v2882_v51, %v2006_v52 }
 0xc77   : > { %v2008_v54 = vmul.f32 0.5, %v2007_v53 }
 0xc79   : > { %v2009_v55 = vsub.f32 1.5, %v2008_v54 }
 0xc7b   : > { %v2010_v56 = vmul.f32 %v2882_v51, %v2009_v55 }
 0xc7d   : > { %v2014_v57 = vsel %vm2013_vm15, %v2882_v51, %v2010_v56 }
 0xc7e   : > { %v2015_v58 = vmul.f32 %v2014_v57, %v1998_v36 }
 0xc80   : > { %v2019_v60 = vmul.f32 %v2855_v63, %v2015_v58 }
 0xc82   : > { %v2023_v61 = vadd.f32 %v2856_v59, %v2019_v60 }
 0xc84   : > { %2641 = vmatmul.msk.f32.vlgmr.msrb.gmra.mxu2 %vm1429_vm1, %v2023_v61 }
 0xd07   : > { %v2052_v3 = vpop.f32.mrf.mxu2 }
 0xd08   : > { %v2053_v4 = vadd.f32 %v2857_v2, %v2052_v3 }
 0xd0a   : > { %v2055_v5 = vmax.f32 %v2053_v4, 0.0 }
 0xd0c   : > { %2642 = vmatmul.msk.f32.vlgmr.msrb.gmra.mxu1 %vm2068_vm0, %v2055_v5 }
 0xd89   : > { %v2089_v7 = vpop.f32.mrf.mxu1 }
 0xd8a   : > { %v2090_v8 = vadd.f32 %v2858_v6, %v2089_v7 }
 0xd8c   : > { %v2092_v9 = vadd.f32 %v2090_v8, %v4092_v32 }
 0xd8e   : > { %2093 = vst.msk [vmem:[#allocation2] sm:$0xff] %vm1429_vm1, %v2092_v9 }
 0xd8f   : > { %2094 = vst.msk [vmem:[%s1342_s30] sm:$0xff] %vm1429_vm1, %v2092_v9 }
 0xd90   : > { %3270 = shalt.err (!%p3267_p11)
}
 0xd91   : > { %2680 = dma.vmem_to_hbm [thread:$0]  (%p3686_p2), %s2120_s17, 128, %s2122_s4, %s2096_s24  }
 0xd92 PF: > { %s4394_s23 = sld [smem:[#allocation43_spill]] }
 0xd93   : > { %s4395_s30 = sld [smem:[#allocation32_spill]] }
 0xd98   : > { %p2724_p0 = scmp.ge.s32.totalorder %s4394_s23, 2 }
 0xd99   : > { %s2136_s27 = sand.u32 1, %s4395_s30  }
 0xd9a   : > { %p2720_p1 = pnand %p2724_p0, %p3693_p9  ;;  %s2137_s1 = scalar_lea.sflag [#allocation5], %s2136_s27 }
 0xd9c   : > { %p2721_p7 = pneg %p2720_p1 }
 0xd9e   : > { %3356 = dma.done.wait (%p2721_p7), %s2137_s1, 128  }
 0xd9f   : > { %3358 = vsyncadd (%p2721_p7), %s2137_s1, 4294967168  ;;  %s60_s5 = sadd.s32 1, %s4394_s23   ;;  %s4398_s29 = sld [smem:[#allocation33_spill]] }
 0xda0   : > { %p4159_p12 = scmp.ge.s32.totalorder %s60_s5, 6   ;;  %s4399_s2 = sld [smem:[#allocation34_spill]] }
 0xda1   : > { %s4400_s6 = sld [smem:[#allocation49_spill]] }
 0xda2   : > { %s4401_s30 = sld [smem:[#allocation35_spill]] }
 0xda3   : > { %s4402_s7 = sld [smem:[#allocation36_spill]] }
 0xda4   : > { %s4403_s3 = sld [smem:[#allocation46_spill]] }
 0xda5   : > { %s4404_s26 = sld [smem:[#allocation37_spill]] }
 0xda6   : > { %s4405_s1 = sld [smem:[#allocation38_spill]] }
 0xda7   : > { %s4406_s8 = sld [smem:[#allocation47_spill]]  ;;  %59 = sbr.rel (!%p4159_p12) target bundleno = 49 (0x31), region = 346 }
 0xda8   : > { %s4407_s27 = sld [smem:[#allocation41_spill]] }
 0xda9   : > { %s4408_s4 = sld [smem:[#allocation42_spill]] }
 0xdaa   : > { %s4409_s28 = sld [smem:[#allocation44_spill]] }
 0xdab   : > { %s4410_s9 = sld [smem:[#allocation45_spill]] }
 0xdac   :  { %2155 = vsyncpa [#allocation4], 1 }
 0xdad   :  { %2157 = vsyncpa [#allocation4 + $0x1], 1 }
 0xdae   :  { %2158 = vsyncpa [#allocation7], 1 }
 0xdaf   :  { %2160 = vsyncpa [#allocation7 + $0x1], 1 }
 0xdb0   :  { %2161 = vsyncpa [#allocation10], 1 }
 0xdb1   :  { %2163 = vsyncpa [#allocation10 + $0x1], 1 }
 0xdb2   :  { %2164 = vsyncpa [#allocation13], 1 }
 0xdb3   :  { %2166 = vsyncpa [#allocation13 + $0x1], 1 }
 0xdb4   :  { %2167 = vsyncpa [#allocation16], 1 }
 0xdb5   :  { %2169 = vsyncpa [#allocation16 + $0x1], 1 }
 0xdb6   :  { %2170 = vsyncpa [#allocation19], 1 }
 0xdb7   :  { %2172 = vsyncpa [#allocation19 + $0x1], 1 }
 0xdb8   :  { %2173 = vsyncpa [#allocation22], 1 }
 0xdb9   :  { %2175 = vsyncpa [#allocation22 + $0x1], 1 }
 0xdba   :  { %2176 = vsyncpa [#allocation5], 1 }
 0xdbb   :  { %2178 = vsyncpa [#allocation5 + $0x1], 1 }

</bundles_post_ra>
